<compile_context>
chip_gen: v7x
topology: tpu7x:2x2x1
jax: 0.10.0
libtpu: 0.0.40
codegen_flags: <defaults>
</compile_context>

<pallas_src>
import functools

import jax
import jax.numpy as jnp
from jax import lax
from jax.experimental import pallas as pl
from jax.experimental.pallas import tpu as pltpu


def _round_up(x, m):
    return -(-x // m) * m


# ----------------------------- parameter setup ------------------------------ #
def _kaiming_normal_fan_out(key, shape):
    # PyTorch kaiming_normal_(mode='fan_out', nonlinearity='relu'):
    # fan_out = Cout * kh * kw, gain = sqrt(2)
    cout, cin, kh, kw = shape
    std = (2.0 / (cout * kh * kw)) ** 0.5
    return std * jax.random.normal(key, shape, dtype=jnp.float32)


def make_params(key, in_channels, out_channels, num_kernels=6):
    """Returns a list of (weight (Cout,Cin,kh,kw), bias (Cout,), (pad_h, pad_w))."""
    conv_cfgs = []
    for i in range(num_kernels // 2):
        conv_cfgs.append(((1, 2 * i + 3), (0, i + 1)))   # horizontal kernel
        conv_cfgs.append(((2 * i + 3, 1), (i + 1, 0)))   # vertical kernel
    conv_cfgs.append(((1, 1), (0, 0)))                    # 1x1 kernel
    keys = jax.random.split(key, len(conv_cfgs))
    params = []
    for k, (ksz, pad) in zip(keys, conv_cfgs):
        w = _kaiming_normal_fan_out(k, (out_channels, in_channels) + ksz)
        b = jnp.zeros((out_channels,), jnp.float32)       # constant_(bias, 0)
        params.append((w, b, pad))
    return params


# ------------------------------- Pallas kernel ------------------------------ #
def _inception_kernel(x_ref, w_ref, b_ref, o_ref, *, offsets, pad_h, w_lo,
                      h_t, W, fuse):
    # x_ref : (Hp, Wp, Cin)                padded NHWC slab of one batch element
    # w_ref : (T*Cin, Cout_pad)  if fuse   deduped / pre-scaled tap weights
    #         (T, Cin, Cout_pad) otherwise
    # b_ref : (1, Cout_pad)                pre-averaged bias (f32)
    # o_ref : (h_t*W, Cout_pad)            flattened output rows of one H tile
    Cin = x_ref.shape[-1]
    T = len(offsets)
    row0 = pl.program_id(1) * h_t             # first output row of this H tile

    def slab(dh, dw):
        rows = pl.ds(row0 + pad_h + dh, h_t)        # leading-dim slice: cheap
        cols = slice(w_lo + dw, w_lo + dw + W)      # aligned for the dw==0 taps
        return x_ref[rows, cols, :]                 # (h_t, W, Cin)

    if fuse:
        # Cin is lane-aligned: im2col-lite concat + one wide-K MXU matmul.
        patch = jnp.concatenate([slab(dh, dw) for dh, dw in offsets], axis=-1)
        patch = patch.reshape(h_t * W, T * Cin)
        y = jnp.dot(patch, w_ref[...], preferred_element_type=jnp.float32)
    else:
        # Small / non-lane-aligned Cin: per-tap K=Cin matmuls accumulated in
        # f32 (no concatenated patch, no cross-lane packing, no lane-padded
        # patch temp).  On v7x the MXU result buffer absorbs the accumulation.
        cout = w_ref.shape[-1]
        y = jnp.zeros((h_t * W, cout), jnp.float32)
        for t, (dh, dw) in enumerate(offsets):
            x_t = slab(dh, dw).reshape(h_t * W, Cin)
            y = y + jnp.dot(x_t, w_ref[t], preferred_element_type=jnp.float32)

    o_ref[...] = (y + b_ref[...]).astype(o_ref.dtype)


# ------------------------- VMEM accounting & tiling -------------------------- #
def _vmem_capacity_bytes():
    try:
        return int(pltpu.get_tpu_info().vmem_capacity_bytes)
    except Exception:
        return 64 * 2 ** 20          # conservative: v7x per-TensorCore VMEM


def _tile_footprint(h_t, W, Cin, T, cout_pad, elt, fuse):
    """VMEM bytes that scale with the h-tile size (incl. lane/sublane padding)."""
    rows = _round_up(h_t * W, 8)
    lane_cin = _round_up(Cin, 128)
    out_blk = 2 * rows * cout_pad * 4             # double-buffered output block
    acc = 2 * rows * cout_pad * 4                 # f32 accumulator + live dot result
    if fuse:
        slabs = 2 * h_t * _round_up(W, 8) * lane_cin * elt
        patch = rows * _round_up(T * Cin, 128) * elt
    else:
        slabs = 3 * h_t * _round_up(W, 8) * lane_cin * elt   # a few live tap slabs
        patch = 0
    return out_blk + acc + slabs + patch


def _pick_h_tile(H, W, Cin, T, cout_pad, elt, fuse, budget_bytes):
    divisors = [d for d in range(1, H + 1) if H % d == 0]
    aligned = [d for d in divisors if d == H or (d * W) % 8 == 0]
    if not aligned:
        aligned = [H]
    good = [d for d in aligned
            if _tile_footprint(d, W, Cin, T, cout_pad, elt, fuse) <= budget_bytes]
    if not good:
        return min(aligned)
    multi = [d for d in good if d < H]            # prefer >= 2 pipeline steps
    return max(multi) if multi else max(good)


# --------------------------------- wrapper ----------------------------------- #
def inception_block_v2(x_nchw, params, compute_dtype=jnp.float32):
    """Forward of Inception_Block_V2.  x_nchw: (N,Cin,H,W) -> (N,Cout,H,W) f32.

    Note: on v5e (low HBM BW, bf16 MXU) prefer compute_dtype=jnp.bfloat16;
    accumulation stays in f32 either way.
    """
    N, Cin, H, W = x_nchw.shape
    Cout = params[0][0].shape[0]
    n_conv = len(params)

    # ---- dedup taps by unique (dh, dw) offset; fold the 1/n_conv scale in ----
    tap_w = {}
    b_sum = jnp.zeros((Cout,), jnp.float32)
    for w, b, (ph, pw) in params:
        _, _, kh, kw = w.shape
        for i in range(kh):
            for j in range(kw):
                off = (i - ph, j - pw)
                m = jnp.transpose(w[:, :, i, j])                # (Cin, Cout)
                tap_w[off] = tap_w[off] + m if off in tap_w else m
        b_sum = b_sum + b
    offsets = tuple(sorted(tap_w.keys()))                       # 13 offsets
    T = len(offsets)

    # Lane-dense output; no extra padding when Cout is already a multiple of
    # 128.  (v6e/v7x could round to 256 when Cout > 128 to fill both MXU
    # halves; kept at 128 granularity for simplicity.)
    cout_pad = _round_up(Cout, 128)
    fuse = (Cin % 128 == 0)          # wide-K concat only when lane-aligned

    w_stack = jnp.stack([tap_w[o] for o in offsets], axis=0) / n_conv  # (T,Cin,Cout)
    w_pad = jnp.pad(w_stack, ((0, 0), (0, 0), (0, cout_pad - Cout)))
    if fuse:
        w_arg = w_pad.reshape(T * Cin, cout_pad).astype(compute_dtype)
        w_block = (T * Cin, cout_pad)
        w_index = lambda n, t: (0, 0)
    else:
        w_arg = w_pad.astype(compute_dtype)
        w_block = (T, Cin, cout_pad)
        w_index = lambda n, t: (0, 0, 0)
    b_mean = jnp.pad(b_sum / n_conv, (0, cout_pad - Cout)).reshape(1, cout_pad)

    pad_h = max(abs(dh) for dh, _ in offsets)
    pad_w = max(abs(dw) for _, dw in offsets)
    w_lo = _round_up(pad_w, 8) if pad_w else 0                  # aligned left pad
    Hp, Wp = H + 2 * pad_h, W + w_lo + pad_w

    # NCHW -> NHWC, one shared zero-padding, optional bf16 for DMA/MXU rate.
    x = jnp.transpose(x_nchw, (0, 2, 3, 1)).astype(compute_dtype)
    x_pad = jnp.pad(x, ((0, 0), (pad_h, pad_h), (w_lo, pad_w), (0, 0)))

    elt = jnp.dtype(compute_dtype).itemsize

    # ---- generation-aware VMEM budget (real footprint, no 2x hedge) ----------
    vmem_cap = _vmem_capacity_bytes()
    soft_cap = (vmem_cap * 3) // 4               # leave compiler headroom
    if fuse:
        w_bytes = _round_up(T * Cin, 8) * cout_pad * elt
    else:
        w_bytes = T * _round_up(Cin, 8) * cout_pad * elt
    fixed = (2 * Hp * _round_up(Wp, 8) * _round_up(Cin, 128) * elt   # resident slab (x2 buf)
             + 2 * w_bytes                                           # weights (x2 buf)
             + 2 * 8 * cout_pad * 4)                                 # bias (x2 buf)
    tile_budget = max(soft_cap - fixed - (4 << 20), 1 << 20)
    h_t = _pick_h_tile(H, W, Cin, T, cout_pad, elt, fuse, tile_budget)
    n_t = H // h_t

    vmem_need = fixed + _tile_footprint(h_t, W, Cin, T, cout_pad, elt, fuse) + (4 << 20)
    vmem_limit = int(min(max(vmem_need, 32 << 20), soft_cap))

    # Megacore: shard over batch when possible (the resident slab is per-batch,
    # so sharding the h-tile axis would duplicate its DMA across cores).
    dims = ("parallel", "arbitrary") if N > 1 else ("arbitrary", "parallel")

    kern = functools.partial(_inception_kernel, offsets=offsets, pad_h=pad_h,
                             w_lo=w_lo, h_t=h_t, W=W, fuse=fuse)

    out_flat = pl.pallas_call(
        kern,
        out_shape=jax.ShapeDtypeStruct((N, H * W, cout_pad), jnp.float32),
        grid_spec=pltpu.PrefetchScalarGridSpec(
            num_scalar_prefetch=0,
            grid=(N, n_t),
            in_specs=[
                # Whole padded slab of batch n: its block index ignores the
                # h-tile axis, so it is DMA'd once per batch item and reused.
                pl.BlockSpec((None, Hp, Wp, Cin), lambda n, t: (n, 0, 0, 0)),
                pl.BlockSpec(w_block, w_index),
                pl.BlockSpec((1, cout_pad), lambda n, t: (0, 0)),
            ],
            out_specs=pl.BlockSpec((None, h_t * W, cout_pad),
                                   lambda n, t: (n, t, 0)),
        ),
        compiler_params=pltpu.CompilerParams(
            dimension_semantics=dims,
            vmem_limit_bytes=vmem_limit),
    )(x_pad, w_arg, b_mean)

    out = out_flat.reshape(N, H, W, cout_pad)[..., :Cout]
    return jnp.transpose(out, (0, 3, 1, 2))                     # back to NCHW


# ------------------------------ pure-JAX reference --------------------------- #
def reference(x_nchw, params):
    outs = []
    for w, b, (ph, pw) in params:
        y = lax.conv_general_dilated(
            x_nchw, w, window_strides=(1, 1),
            padding=((ph, ph), (pw, pw)),
            dimension_numbers=('NCHW', 'OIHW', 'NCHW'))
        outs.append(y + b[None, :, None, None])
    return jnp.mean(jnp.stack(outs, axis=-1), axis=-1)


# ----------------------------------- main ------------------------------------ #
if __name__ == "__main__":
    key = jax.random.PRNGKey(0)
    k_x, k_p, k_x2, k_p2 = jax.random.split(key, 4)

    # --- small-channel case (per-tap accumulation path, Cin % 128 != 0) -------
    N, Cin, Cout, H, W = 2, 4, 8, 16, 16
    x = jax.random.normal(k_x, (N, Cin, H, W), dtype=jnp.float32)
    params = make_params(k_p, Cin, Cout, num_kernels=6)
    ref = jax.block_until_ready(reference(x, params))

    out = jax.block_until_ready(inception_block_v2(x, params))
    assert out.shape == (N, Cout, H, W), out.shape
    assert jnp.allclose(out, ref, atol=1e-4, rtol=1e-4), float(
        jnp.max(jnp.abs(out - ref)))

    # bf16 input/weight path (f32 MXU accumulation): relaxed tolerance.
    out_bf16 = jax.block_until_ready(
        inception_block_v2(x, params, compute_dtype=jnp.bfloat16))
    assert jnp.allclose(out_bf16, ref, atol=5e-2, rtol=5e-2), float(
        jnp.max(jnp.abs(out_bf16 - ref)))

    # --- lane-aligned case (fused wide-K matmul path, Cin % 128 == 0) ---------
    N2, Cin2, Cout2, H2, W2 = 1, 128, 128, 8, 16
    x2 = jax.random.normal(k_x2, (N2, Cin2, H2, W2), dtype=jnp.float32)
    params2 = make_params(k_p2, Cin2, Cout2, num_kernels=6)
    ref2 = jax.block_until_ready(reference(x2, params2))
    out2 = jax.block_until_ready(inception_block_v2(x2, params2))
    assert out2.shape == (N2, Cout2, H2, W2), out2.shape
    assert jnp.allclose(out2, ref2, atol=1e-2, rtol=1e-2), float(
        jnp.max(jnp.abs(out2 - ref2)))

    print("KERNEL_OK")
</pallas_src>

<mosaic_0001>
module attributes {stable_mosaic.version = 11 : i64} {
  func.func @_inception_kernel(%arg0: i32, %arg1: i32, %arg2: memref<1x22x27x4xf32, #tpu.memory_space<vmem>>, %arg3: memref<13x4x128xf32, #tpu.memory_space<vmem>>, %arg4: memref<1x128xf32, #tpu.memory_space<vmem>>, %arg5: memref<1x128x128xf32, #tpu.memory_space<vmem>>) attributes {dimension_semantics = [#tpu.dimension_semantics<parallel>, #tpu.dimension_semantics<arbitrary>], iteration_bounds = array<i64: 2, 2>, scalar_prefetch = 0 : i64, scratch_operands = 0 : i64, tpu.core_type = #tpu.core_type<tc>, window_params = [{transform_indices = @transform_0, window_bounds = array<i64: 1, 22, 27, 4>}, {pipeline_mode = #tpu.pipeline_mode<synchronous>, transform_indices = @transform_1, window_bounds = array<i64: 13, 4, 128>}, {pipeline_mode = #tpu.pipeline_mode<synchronous>, transform_indices = @transform_2, window_bounds = array<i64: 1, 128>}, {transform_indices = @transform_3, window_bounds = array<i64: 1, 128, 128>}]} {
    %c8_i32 = arith.constant 8 : i32
    %0 = arith.muli %arg1, %c8_i32 : i32
    %cst = arith.constant 0.000000e+00 : f32
    %1 = vector.broadcast %cst : f32 to vector<128x128xf32>
    %c3_i32 = arith.constant 3 : i32
    %2 = arith.addi %0, %c3_i32 : i32
    %c-3_i32 = arith.constant -3 : i32
    %3 = arith.addi %2, %c-3_i32 : i32
    %c0 = arith.constant 0 : index
    %4 = arith.index_cast %3 : i32 to index
    %c8 = arith.constant 8 : index
    %c0_0 = arith.constant 0 : index
    %5 = vector.load %arg2[%c0, %4, %c8, %c0_0] : memref<1x22x27x4xf32, #tpu.memory_space<vmem>>, vector<1x8x16x4xf32>
    %6 = vector.shape_cast %5 : vector<1x8x16x4xf32> to vector<8x16x4xf32>
    %7 = vector.shape_cast %6 : vector<8x16x4xf32> to vector<128x4xf32>
    %c0_1 = arith.constant 0 : index
    %c0_2 = arith.constant 0 : index
    %c0_3 = arith.constant 0 : index
    %8 = vector.load %arg3[%c0_1, %c0_2, %c0_3] : memref<13x4x128xf32, #tpu.memory_space<vmem>>, vector<1x4x128xf32>
    %9 = vector.shape_cast %8 : vector<1x4x128xf32> to vector<4x128xf32>
    %cst_4 = arith.constant dense<0.000000e+00> : vector<128x128xf32>
    %10 = tpu.matmul %7, %9, %cst_4 {dimension_numbers = #tpu.dot_dimension_numbers<[1], [0], [0], [1], [0, 0, 1, 1], [], []>} : vector<128x4xf32>, vector<4x128xf32>, vector<128x128xf32> -> vector<128x128xf32>
    %11 = arith.addf %1, %10 : vector<128x128xf32>
    %c3_i32_5 = arith.constant 3 : i32
    %12 = arith.addi %0, %c3_i32_5 : i32
    %c-2_i32 = arith.constant -2 : i32
    %13 = arith.addi %12, %c-2_i32 : i32
    %c0_6 = arith.constant 0 : index
    %14 = arith.index_cast %13 : i32 to index
    %c8_7 = arith.constant 8 : index
    %c0_8 = arith.constant 0 : index
    %15 = vector.load %arg2[%c0_6, %14, %c8_7, %c0_8] : memref<1x22x27x4xf32, #tpu.memory_space<vmem>>, vector<1x8x16x4xf32>
    %16 = vector.shape_cast %15 : vector<1x8x16x4xf32> to vector<8x16x4xf32>
    %17 = vector.shape_cast %16 : vector<8x16x4xf32> to vector<128x4xf32>
    %c1 = arith.constant 1 : index
    %c0_9 = arith.constant 0 : index
    %c0_10 = arith.constant 0 : index
    %18 = vector.load %arg3[%c1, %c0_9, %c0_10] : memref<13x4x128xf32, #tpu.memory_space<vmem>>, vector<1x4x128xf32>
    %19 = vector.shape_cast %18 : vector<1x4x128xf32> to vector<4x128xf32>
    %cst_11 = arith.constant dense<0.000000e+00> : vector<128x128xf32>
    %20 = tpu.matmul %17, %19, %cst_11 {dimension_numbers = #tpu.dot_dimension_numbers<[1], [0], [0], [1], [0, 0, 1, 1], [], []>} : vector<128x4xf32>, vector<4x128xf32>, vector<128x128xf32> -> vector<128x128xf32>
    %21 = arith.addf %11, %20 : vector<128x128xf32>
    %c3_i32_12 = arith.constant 3 : i32
    %22 = arith.addi %0, %c3_i32_12 : i32
    %c-1_i32 = arith.constant -1 : i32
    %23 = arith.addi %22, %c-1_i32 : i32
    %c0_13 = arith.constant 0 : index
    %24 = arith.index_cast %23 : i32 to index
    %c8_14 = arith.constant 8 : index
    %c0_15 = arith.constant 0 : index
    %25 = vector.load %arg2[%c0_13, %24, %c8_14, %c0_15] : memref<1x22x27x4xf32, #tpu.memory_space<vmem>>, vector<1x8x16x4xf32>
    %26 = vector.shape_cast %25 : vector<1x8x16x4xf32> to vector<8x16x4xf32>
    %27 = vector.shape_cast %26 : vector<8x16x4xf32> to vector<128x4xf32>
    %c2 = arith.constant 2 : index
    %c0_16 = arith.constant 0 : index
    %c0_17 = arith.constant 0 : index
    %28 = vector.load %arg3[%c2, %c0_16, %c0_17] : memref<13x4x128xf32, #tpu.memory_space<vmem>>, vector<1x4x128xf32>
    %29 = vector.shape_cast %28 : vector<1x4x128xf32> to vector<4x128xf32>
    %cst_18 = arith.constant dense<0.000000e+00> : vector<128x128xf32>
    %30 = tpu.matmul %27, %29, %cst_18 {dimension_numbers = #tpu.dot_dimension_numbers<[1], [0], [0], [1], [0, 0, 1, 1], [], []>} : vector<128x4xf32>, vector<4x128xf32>, vector<128x128xf32> -> vector<128x128xf32>
    %31 = arith.addf %21, %30 : vector<128x128xf32>
    %c3_i32_19 = arith.constant 3 : i32
    %32 = arith.addi %0, %c3_i32_19 : i32
    %c0_i32 = arith.constant 0 : i32
    %33 = arith.addi %32, %c0_i32 : i32
    %c0_20 = arith.constant 0 : index
    %34 = arith.index_cast %33 : i32 to index
    %c5 = arith.constant 5 : index
    %c0_21 = arith.constant 0 : index
    %35 = vector.load %arg2[%c0_20, %34, %c5, %c0_21] : memref<1x22x27x4xf32, #tpu.memory_space<vmem>>, vector<1x8x16x4xf32>
    %36 = vector.shape_cast %35 : vector<1x8x16x4xf32> to vector<8x16x4xf32>
    %37 = vector.shape_cast %36 : vector<8x16x4xf32> to vector<128x4xf32>
    %c3 = arith.constant 3 : index
    %c0_22 = arith.constant 0 : index
    %c0_23 = arith.constant 0 : index
    %38 = vector.load %arg3[%c3, %c0_22, %c0_23] : memref<13x4x128xf32, #tpu.memory_space<vmem>>, vector<1x4x128xf32>
    %39 = vector.shape_cast %38 : vector<1x4x128xf32> to vector<4x128xf32>
    %cst_24 = arith.constant dense<0.000000e+00> : vector<128x128xf32>
    %40 = tpu.matmul %37, %39, %cst_24 {dimension_numbers = #tpu.dot_dimension_numbers<[1], [0], [0], [1], [0, 0, 1, 1], [], []>} : vector<128x4xf32>, vector<4x128xf32>, vector<128x128xf32> -> vector<128x128xf32>
    %41 = arith.addf %31, %40 : vector<128x128xf32>
    %c3_i32_25 = arith.constant 3 : i32
    %42 = arith.addi %0, %c3_i32_25 : i32
    %c0_i32_26 = arith.constant 0 : i32
    %43 = arith.addi %42, %c0_i32_26 : i32
    %c0_27 = arith.constant 0 : index
    %44 = arith.index_cast %43 : i32 to index
    %c6 = arith.constant 6 : index
    %c0_28 = arith.constant 0 : index
    %45 = vector.load %arg2[%c0_27, %44, %c6, %c0_28] : memref<1x22x27x4xf32, #tpu.memory_space<vmem>>, vector<1x8x16x4xf32>
    %46 = vector.shape_cast %45 : vector<1x8x16x4xf32> to vector<8x16x4xf32>
    %47 = vector.shape_cast %46 : vector<8x16x4xf32> to vector<128x4xf32>
    %c4 = arith.constant 4 : index
    %c0_29 = arith.constant 0 : index
    %c0_30 = arith.constant 0 : index
    %48 = vector.load %arg3[%c4, %c0_29, %c0_30] : memref<13x4x128xf32, #tpu.memory_space<vmem>>, vector<1x4x128xf32>
    %49 = vector.shape_cast %48 : vector<1x4x128xf32> to vector<4x128xf32>
    %cst_31 = arith.constant dense<0.000000e+00> : vector<128x128xf32>
    %50 = tpu.matmul %47, %49, %cst_31 {dimension_numbers = #tpu.dot_dimension_numbers<[1], [0], [0], [1], [0, 0, 1, 1], [], []>} : vector<128x4xf32>, vector<4x128xf32>, vector<128x128xf32> -> vector<128x128xf32>
    %51 = arith.addf %41, %50 : vector<128x128xf32>
    %c3_i32_32 = arith.constant 3 : i32
    %52 = arith.addi %0, %c3_i32_32 : i32
    %c0_i32_33 = arith.constant 0 : i32
    %53 = arith.addi %52, %c0_i32_33 : i32
    %c0_34 = arith.constant 0 : index
    %54 = arith.index_cast %53 : i32 to index
    %c7 = arith.constant 7 : index
    %c0_35 = arith.constant 0 : index
    %55 = vector.load %arg2[%c0_34, %54, %c7, %c0_35] : memref<1x22x27x4xf32, #tpu.memory_space<vmem>>, vector<1x8x16x4xf32>
    %56 = vector.shape_cast %55 : vector<1x8x16x4xf32> to vector<8x16x4xf32>
    %57 = vector.shape_cast %56 : vector<8x16x4xf32> to vector<128x4xf32>
    %c5_36 = arith.constant 5 : index
    %c0_37 = arith.constant 0 : index
    %c0_38 = arith.constant 0 : index
    %58 = vector.load %arg3[%c5_36, %c0_37, %c0_38] : memref<13x4x128xf32, #tpu.memory_space<vmem>>, vector<1x4x128xf32>
    %59 = vector.shape_cast %58 : vector<1x4x128xf32> to vector<4x128xf32>
    %cst_39 = arith.constant dense<0.000000e+00> : vector<128x128xf32>
    %60 = tpu.matmul %57, %59, %cst_39 {dimension_numbers = #tpu.dot_dimension_numbers<[1], [0], [0], [1], [0, 0, 1, 1], [], []>} : vector<128x4xf32>, vector<4x128xf32>, vector<128x128xf32> -> vector<128x128xf32>
    %61 = arith.addf %51, %60 : vector<128x128xf32>
    %c3_i32_40 = arith.constant 3 : i32
    %62 = arith.addi %0, %c3_i32_40 : i32
    %c0_i32_41 = arith.constant 0 : i32
    %63 = arith.addi %62, %c0_i32_41 : i32
    %c0_42 = arith.constant 0 : index
    %64 = arith.index_cast %63 : i32 to index
    %c8_43 = arith.constant 8 : index
    %c0_44 = arith.constant 0 : index
    %65 = vector.load %arg2[%c0_42, %64, %c8_43, %c0_44] : memref<1x22x27x4xf32, #tpu.memory_space<vmem>>, vector<1x8x16x4xf32>
    %66 = vector.shape_cast %65 : vector<1x8x16x4xf32> to vector<8x16x4xf32>
    %67 = vector.shape_cast %66 : vector<8x16x4xf32> to vector<128x4xf32>
    %c6_45 = arith.constant 6 : index
    %c0_46 = arith.constant 0 : index
    %c0_47 = arith.constant 0 : index
    %68 = vector.load %arg3[%c6_45, %c0_46, %c0_47] : memref<13x4x128xf32, #tpu.memory_space<vmem>>, vector<1x4x128xf32>
    %69 = vector.shape_cast %68 : vector<1x4x128xf32> to vector<4x128xf32>
    %cst_48 = arith.constant dense<0.000000e+00> : vector<128x128xf32>
    %70 = tpu.matmul %67, %69, %cst_48 {dimension_numbers = #tpu.dot_dimension_numbers<[1], [0], [0], [1], [0, 0, 1, 1], [], []>} : vector<128x4xf32>, vector<4x128xf32>, vector<128x128xf32> -> vector<128x128xf32>
    %71 = arith.addf %61, %70 : vector<128x128xf32>
    %c3_i32_49 = arith.constant 3 : i32
    %72 = arith.addi %0, %c3_i32_49 : i32
    %c0_i32_50 = arith.constant 0 : i32
    %73 = arith.addi %72, %c0_i32_50 : i32
    %c0_51 = arith.constant 0 : index
    %74 = arith.index_cast %73 : i32 to index
    %c9 = arith.constant 9 : index
    %c0_52 = arith.constant 0 : index
    %75 = vector.load %arg2[%c0_51, %74, %c9, %c0_52] : memref<1x22x27x4xf32, #tpu.memory_space<vmem>>, vector<1x8x16x4xf32>
    %76 = vector.shape_cast %75 : vector<1x8x16x4xf32> to vector<8x16x4xf32>
    %77 = vector.shape_cast %76 : vector<8x16x4xf32> to vector<128x4xf32>
    %c7_53 = arith.constant 7 : index
    %c0_54 = arith.constant 0 : index
    %c0_55 = arith.constant 0 : index
    %78 = vector.load %arg3[%c7_53, %c0_54, %c0_55] : memref<13x4x128xf32, #tpu.memory_space<vmem>>, vector<1x4x128xf32>
    %79 = vector.shape_cast %78 : vector<1x4x128xf32> to vector<4x128xf32>
    %cst_56 = arith.constant dense<0.000000e+00> : vector<128x128xf32>
    %80 = tpu.matmul %77, %79, %cst_56 {dimension_numbers = #tpu.dot_dimension_numbers<[1], [0], [0], [1], [0, 0, 1, 1], [], []>} : vector<128x4xf32>, vector<4x128xf32>, vector<128x128xf32> -> vector<128x128xf32>
    %81 = arith.addf %71, %80 : vector<128x128xf32>
    %c3_i32_57 = arith.constant 3 : i32
    %82 = arith.addi %0, %c3_i32_57 : i32
    %c0_i32_58 = arith.constant 0 : i32
    %83 = arith.addi %82, %c0_i32_58 : i32
    %c0_59 = arith.constant 0 : index
    %84 = arith.index_cast %83 : i32 to index
    %c10 = arith.constant 10 : index
    %c0_60 = arith.constant 0 : index
    %85 = vector.load %arg2[%c0_59, %84, %c10, %c0_60] : memref<1x22x27x4xf32, #tpu.memory_space<vmem>>, vector<1x8x16x4xf32>
    %86 = vector.shape_cast %85 : vector<1x8x16x4xf32> to vector<8x16x4xf32>
    %87 = vector.shape_cast %86 : vector<8x16x4xf32> to vector<128x4xf32>
    %c8_61 = arith.constant 8 : index
    %c0_62 = arith.constant 0 : index
    %c0_63 = arith.constant 0 : index
    %88 = vector.load %arg3[%c8_61, %c0_62, %c0_63] : memref<13x4x128xf32, #tpu.memory_space<vmem>>, vector<1x4x128xf32>
    %89 = vector.shape_cast %88 : vector<1x4x128xf32> to vector<4x128xf32>
    %cst_64 = arith.constant dense<0.000000e+00> : vector<128x128xf32>
    %90 = tpu.matmul %87, %89, %cst_64 {dimension_numbers = #tpu.dot_dimension_numbers<[1], [0], [0], [1], [0, 0, 1, 1], [], []>} : vector<128x4xf32>, vector<4x128xf32>, vector<128x128xf32> -> vector<128x128xf32>
    %91 = arith.addf %81, %90 : vector<128x128xf32>
    %c3_i32_65 = arith.constant 3 : i32
    %92 = arith.addi %0, %c3_i32_65 : i32
    %c0_i32_66 = arith.constant 0 : i32
    %93 = arith.addi %92, %c0_i32_66 : i32
    %c0_67 = arith.constant 0 : index
    %94 = arith.index_cast %93 : i32 to index
    %c11 = arith.constant 11 : index
    %c0_68 = arith.constant 0 : index
    %95 = vector.load %arg2[%c0_67, %94, %c11, %c0_68] : memref<1x22x27x4xf32, #tpu.memory_space<vmem>>, vector<1x8x16x4xf32>
    %96 = vector.shape_cast %95 : vector<1x8x16x4xf32> to vector<8x16x4xf32>
    %97 = vector.shape_cast %96 : vector<8x16x4xf32> to vector<128x4xf32>
    %c9_69 = arith.constant 9 : index
    %c0_70 = arith.constant 0 : index
    %c0_71 = arith.constant 0 : index
    %98 = vector.load %arg3[%c9_69, %c0_70, %c0_71] : memref<13x4x128xf32, #tpu.memory_space<vmem>>, vector<1x4x128xf32>
    %99 = vector.shape_cast %98 : vector<1x4x128xf32> to vector<4x128xf32>
    %cst_72 = arith.constant dense<0.000000e+00> : vector<128x128xf32>
    %100 = tpu.matmul %97, %99, %cst_72 {dimension_numbers = #tpu.dot_dimension_numbers<[1], [0], [0], [1], [0, 0, 1, 1], [], []>} : vector<128x4xf32>, vector<4x128xf32>, vector<128x128xf32> -> vector<128x128xf32>
    %101 = arith.addf %91, %100 : vector<128x128xf32>
    %c3_i32_73 = arith.constant 3 : i32
    %102 = arith.addi %0, %c3_i32_73 : i32
    %c1_i32 = arith.constant 1 : i32
    %103 = arith.addi %102, %c1_i32 : i32
    %c0_74 = arith.constant 0 : index
    %104 = arith.index_cast %103 : i32 to index
    %c8_75 = arith.constant 8 : index
    %c0_76 = arith.constant 0 : index
    %105 = vector.load %arg2[%c0_74, %104, %c8_75, %c0_76] : memref<1x22x27x4xf32, #tpu.memory_space<vmem>>, vector<1x8x16x4xf32>
    %106 = vector.shape_cast %105 : vector<1x8x16x4xf32> to vector<8x16x4xf32>
    %107 = vector.shape_cast %106 : vector<8x16x4xf32> to vector<128x4xf32>
    %c10_77 = arith.constant 10 : index
    %c0_78 = arith.constant 0 : index
    %c0_79 = arith.constant 0 : index
    %108 = vector.load %arg3[%c10_77, %c0_78, %c0_79] : memref<13x4x128xf32, #tpu.memory_space<vmem>>, vector<1x4x128xf32>
    %109 = vector.shape_cast %108 : vector<1x4x128xf32> to vector<4x128xf32>
    %cst_80 = arith.constant dense<0.000000e+00> : vector<128x128xf32>
    %110 = tpu.matmul %107, %109, %cst_80 {dimension_numbers = #tpu.dot_dimension_numbers<[1], [0], [0], [1], [0, 0, 1, 1], [], []>} : vector<128x4xf32>, vector<4x128xf32>, vector<128x128xf32> -> vector<128x128xf32>
    %111 = arith.addf %101, %110 : vector<128x128xf32>
    %c3_i32_81 = arith.constant 3 : i32
    %112 = arith.addi %0, %c3_i32_81 : i32
    %c2_i32 = arith.constant 2 : i32
    %113 = arith.addi %112, %c2_i32 : i32
    %c0_82 = arith.constant 0 : index
    %114 = arith.index_cast %113 : i32 to index
    %c8_83 = arith.constant 8 : index
    %c0_84 = arith.constant 0 : index
    %115 = vector.load %arg2[%c0_82, %114, %c8_83, %c0_84] : memref<1x22x27x4xf32, #tpu.memory_space<vmem>>, vector<1x8x16x4xf32>
    %116 = vector.shape_cast %115 : vector<1x8x16x4xf32> to vector<8x16x4xf32>
    %117 = vector.shape_cast %116 : vector<8x16x4xf32> to vector<128x4xf32>
    %c11_85 = arith.constant 11 : index
    %c0_86 = arith.constant 0 : index
    %c0_87 = arith.constant 0 : index
    %118 = vector.load %arg3[%c11_85, %c0_86, %c0_87] : memref<13x4x128xf32, #tpu.memory_space<vmem>>, vector<1x4x128xf32>
    %119 = vector.shape_cast %118 : vector<1x4x128xf32> to vector<4x128xf32>
    %cst_88 = arith.constant dense<0.000000e+00> : vector<128x128xf32>
    %120 = tpu.matmul %117, %119, %cst_88 {dimension_numbers = #tpu.dot_dimension_numbers<[1], [0], [0], [1], [0, 0, 1, 1], [], []>} : vector<128x4xf32>, vector<4x128xf32>, vector<128x128xf32> -> vector<128x128xf32>
    %121 = arith.addf %111, %120 : vector<128x128xf32>
    %c3_i32_89 = arith.constant 3 : i32
    %122 = arith.addi %0, %c3_i32_89 : i32
    %c3_i32_90 = arith.constant 3 : i32
    %123 = arith.addi %122, %c3_i32_90 : i32
    %c0_91 = arith.constant 0 : index
    %124 = arith.index_cast %123 : i32 to index
    %c8_92 = arith.constant 8 : index
    %c0_93 = arith.constant 0 : index
    %125 = vector.load %arg2[%c0_91, %124, %c8_92, %c0_93] : memref<1x22x27x4xf32, #tpu.memory_space<vmem>>, vector<1x8x16x4xf32>
    %126 = vector.shape_cast %125 : vector<1x8x16x4xf32> to vector<8x16x4xf32>
    %127 = vector.shape_cast %126 : vector<8x16x4xf32> to vector<128x4xf32>
    %c12 = arith.constant 12 : index
    %c0_94 = arith.constant 0 : index
    %c0_95 = arith.constant 0 : index
    %128 = vector.load %arg3[%c12, %c0_94, %c0_95] : memref<13x4x128xf32, #tpu.memory_space<vmem>>, vector<1x4x128xf32>
    %129 = vector.shape_cast %128 : vector<1x4x128xf32> to vector<4x128xf32>
    %cst_96 = arith.constant dense<0.000000e+00> : vector<128x128xf32>
    %130 = tpu.matmul %127, %129, %cst_96 {dimension_numbers = #tpu.dot_dimension_numbers<[1], [0], [0], [1], [0, 0, 1, 1], [], []>} : vector<128x4xf32>, vector<4x128xf32>, vector<128x128xf32> -> vector<128x128xf32>
    %131 = arith.addf %121, %130 : vector<128x128xf32>
    %c0_97 = arith.constant 0 : index
    %c0_98 = arith.constant 0 : index
    %132 = vector.load %arg4[%c0_97, %c0_98] : memref<1x128xf32, #tpu.memory_space<vmem>>, vector<1x128xf32>
    %133 = vector.broadcast %132 : vector<1x128xf32> to vector<128x128xf32>
    %134 = arith.addf %131, %133 : vector<128x128xf32>
    %c0_99 = arith.constant 0 : index
    %c0_100 = arith.constant 0 : index
    %c0_101 = arith.constant 0 : index
    %135 = vector.load %arg5[%c0_99, %c0_100, %c0_101] : memref<1x128x128xf32, #tpu.memory_space<vmem>>, vector<1x128x128xf32>
    %136 = vector.shape_cast %135 : vector<1x128x128xf32> to vector<128x128xf32>
    %137 = vector.shape_cast %134 : vector<128x128xf32> to vector<1x128x128xf32>
    tpu.vector_store %arg5[%c0_99, %c0_100, %c0_101], %137 {strides = array<i32>} : memref<1x128x128xf32, #tpu.memory_space<vmem>>, vector<1x128x128xf32>,
    return
  }
  func.func @transform_0(%arg0: i32, %arg1: i32) -> (i32, i32, i32, i32) {
    %c0_i32 = arith.constant 0 : i32
    %c0_i32_0 = arith.constant 0 : i32
    %c0_i32_1 = arith.constant 0 : i32
    %c0_i32_2 = arith.constant 0 : i32
    return %arg0, %c0_i32, %c0_i32_0, %c0_i32_1 : i32, i32, i32, i32
  }
  func.func @transform_1(%arg0: i32, %arg1: i32) -> (i32, i32, i32) {
    %c0_i32 = arith.constant 0 : i32
    %c0_i32_0 = arith.constant 0 : i32
    %c0_i32_1 = arith.constant 0 : i32
    %c0_i32_2 = arith.constant 0 : i32
    return %c0_i32, %c0_i32_0, %c0_i32_1 : i32, i32, i32
  }
  func.func @transform_2(%arg0: i32, %arg1: i32) -> (i32, i32) {
    %c0_i32 = arith.constant 0 : i32
    %c0_i32_0 = arith.constant 0 : i32
    %c0_i32_1 = arith.constant 0 : i32
    return %c0_i32, %c0_i32_0 : i32, i32
  }
  func.func @transform_3(%arg0: i32, %arg1: i32) -> (i32, i32, i32) {
    %c0_i32 = arith.constant 0 : i32
    %c0_i32_0 = arith.constant 0 : i32
    return %arg0, %arg1, %c0_i32 : i32, i32, i32
  }
}

</mosaic_0001>

<bundles_post_ra>
// kernel: tpu_custom_call.1
= control target key start
LH: loop header
LB: loop body
LE: loop exit
PB: predicated region body
PF: predicated region fallthrough
CT: control target
= control target key end

     0   :  { %8 = vsyncpa [#allocation3], 0  ;;  %s5477_s0 = inlined_call_operand.vmem [shape: f32[2,22,27,4], index: 0, kind: input, shape index: {}]   ;;  %s5478_s1 = inlined_call_operand.vmem [shape: f32[13,4,128], index: 1, kind: input, shape index: {}]   ;;  %s5479_s2 = inlined_call_operand.vmem [shape: f32[1,128], index: 2, kind: input, shape index: {}]   ;;  %s5480_s3 = inlined_call_operand.hbm [shape: f32[2,256,128], index: 3, kind: output, shape index: {}]  }
   0x1   :  { %10 = vsyncpa [#allocation3 + $0x1], 0  ;;  %s4727_s12 = smov 0   ;;  %s4729_s13 = smov 0  }
   0x2   :  { %s4731_s14 = smov 0   ;;  %s4733_s15 = smov 0  }
   0x3   :  { %s4735_s16 = smov 0   ;;  %s4737_s17 = smov 0  }
   0x4   :  { %s4739_s18 = smov 0   ;;  %s4741_s19 = smov 0  }
   0x5 LB: > { %s3321_s20 = sadd.s32 4294967295, %s4702_s19   ;;  %s3322_s21 = sadd.s32 4294967294, %s4702_s19   ;;  %s4702_s19 = sphi %s4741_s19, %s16_s19   ;;  %s4698_s18 = sphi %s4739_s18, %s5489_s18   ;;  %s4694_s17 = sphi %s4737_s17, %s5488_s17   ;;  %s4690_s16 = sphi %s4735_s16, %s5487_s16   ;;  %s4686_s15 = sphi %s4733_s15, %s5486_s15   ;;  %s4682_s14 = sphi %s4731_s14, %s5485_s14   ;;  %s4678_s13 = sphi %s4729_s13, %s5484_s13   ;;  %s4674_s12 = sphi %s4727_s12, %s5483_s12  }
   0x6   : > { %s25_s22 = sadd.s32 1, %s4694_s17  ;;  %s28_s23 = sadd.s32 1, %s4698_s18 }
   0x7   : > { %p26_p0 = scmp.ge.s32.totalorder %s25_s22, 2  ;;  %p115_p1 = scmp.ne.s32.totalorder %s4682_s14, %s4678_s13 }
   0x8   : > { %p116_p2 = scmp.eq.s32.totalorder %s3321_s20, 3  ;;  %p121_p5 = scmp.ne.s32.totalorder %s4678_s13, %s4674_s12 }
   0x9   : > { %s5491_s22 = smov (%p26_p0, %s25_s22), 0  ;;  %s5493_s23 = smov (!%p26_p0, %s28_s23), %s4698_s18 }
   0xa   : > { %s101_s24 = ssub.s32 %s4694_s17, %s5491_s22  ;;  %p4778_p3 = por %p116_p2, %p115_p1 }
   0xb   : > { %p30_p4 = scmp.ge.s32.totalorder %s5493_s23, 2  ;;  %p122_p6 = scmp.eq.s32.totalorder %s3322_s21, 3 }
   0xc   : > { %p3325_p7 = scmp.ge.s32.totalorder %s4702_s19, 1  ;;  %p154_p9 = scmp.lt.s32.totalorder %s4702_s19, 5 }
   0xd   : > { %s5495_s23 = smov (%p30_p4, %s5493_s23), 0  ;;  %p4787_p8 = por %p122_p6, %p121_p5 }
   0xe   : > { %s100_s27 = ssub.s32 %s4698_s18, %s5495_s23  ;;  %s105_s28 = sadd.s32 1, %s4682_s14 }
   0xf   : > { %s102_s29 = sor.u32 %s101_s24, %s100_s27  ;;  %p155_p10 = pnand %p3325_p7, %p154_p9 }
  0x10   : > { %p103_p11 = scmp.eq.s32.totalorder %s102_s29, 0  ;;  %v3348_v0 = vld [vmem:[%s5478_s1 + $0x4] sm:$0xf] (!%p155_p10)  ;;  %vm274_vm0 = vcmask (!%p155_p10), 1043456   ;;  %v4804_v1 = vld [vmem:[%s5478_s1 + $0x18] sm:$0xf] (!%p155_p10) }
  0x11   : > { %158 = sbr.rel (%p155_p10) target bundleno = 469 (0x1d5), region = 32  ;;  %p178_p12 = scmp.lt.s32.totalorder (!%p155_p10), %s4690_s16, 1  ;;  %4002 = vmatprep.subr.msk.mxu1 (!%p155_p10), %vm274_vm0, %v3348_v0  ;;  %4158 = vmatprep.subr.msk.mxu0 (!%p155_p10), %vm274_vm0, %v4804_v1  ;;  %v203_v2 = vld [vmem:[%s5478_s1] sm:$0xf] (!%p155_p10)  ;;  %v3573_v3 = vld [vmem:[%s5478_s1 + $0x1c] sm:$0xf] (!%p155_p10) }
  0x12   : > { %s4796_s30 = scalar_select %p103_p11, %s4682_s14, %s105_s28  }
  0x13   : > { %4003 = vmatpush3.msk.msra.mxu1 (!%p155_p10), %vm274_vm0, %v3348_v0  ;;  %4159 = vmatpush3.msk.msra.mxu0 (!%p155_p10), %vm274_vm0, %v4804_v1  ;;  %s3774_s24 = sshll.u32 (!%p155_p10), %s4686_s15, 8  ;;  %vm225_vm1 = vcmask (!%p155_p10), 31744   ;;  %v3607_v10 = vld [vmem:[%s5478_s1 + $0x20] sm:$0xf] (!%p155_p10)  ;;  %v4860_v11 = vld [vmem:[%s5478_s1 + $0x8] sm:$0xf] (!%p155_p10) }
  0x14   : > { %4028 = vmatprep.subr.msk.mxu1 (!%p155_p10), %vm274_vm0, %v203_v2  ;;  %4184 = vmatprep.subr.msk.mxu0 (!%p155_p10), %vm274_vm0, %v3573_v3  ;;  %v4918_v21 = vld [vmem:[%s5478_s1 + $0x24] sm:$0xf] (!%p155_p10)  ;;  %v3437_v36 = vld [vmem:[%s5478_s1 + $0xc] sm:$0xf] (!%p155_p10)  ;;  %v3677_v45 = vld [vmem:[%s5478_s1 + $0x28] sm:$0xf] (!%p155_p10) }
  0x15   : > { %v3471_v54 = vld [vmem:[%s5478_s1 + $0x10] sm:$0xf] (!%p155_p10)  ;;  %v5083_v63 = vld [vmem:[%s5478_s1 + $0x2c] sm:$0xf] (!%p155_p10)  ;;  %s175_s10 = sand.u32 (!%p155_p10), 1, %s4678_s13   ;;  %s3770_s27 = sshll.u32 (!%p155_p10), %s4690_s16, 5 }
  0x16   : > { %s3326_s11 = sshll.u32 (!%p155_p10), %s175_s10, 7  ;;  %s5425_s7 = scalar_lea.sflag (!%p155_p10), [#allocation3], %s175_s10 }
  0x17   : > { %s4704_s9 = smov (!%p155_p10), [#allocation2]  }
  0x18   : > { %s179_s20 = scalar_select %p178_p12, %s4690_s16, 1 }
  0x1a   : > { %s4534_s21 = smul.u32 704, %s179_s20 }
  0x1c   : > { %s182_s29 = scalar_lea.vmem %s5477_s0, %s4534_s21 }
  0x1d   : > { %s4826_s4 = scalar_lea.vmem %s182_s29, %s3774_s24  ;;  %s3769_s24 = sshll.u32 %s4686_s15, 4 }
  0x1e   : > { %v4829_v4 = vld [vmem:[%s4826_s4 + $0x28] sm:$0xff]  ;;  %v4835_v6 = vld [vmem:[%s4826_s4 + $0x30] sm:$0xff]  ;;  %s3216_s28 = sadd.s32 %s3770_s27, %s3769_s24 }
  0x1f   : > { %v4832_v5 = vld [vmem:[%s4826_s4 + $0x68] sm:$0xff]  ;;  %4004 = vmatprep.mubr.msk.f32.mxu1 %vm225_vm1, %v4829_v4  ;;  %v4842_v7 = vld [vmem:[%s4826_s4 + $0x70] sm:$0xff]  ;;  %s3771_s15 = sshll.u32 %s3216_s28, 7 }
  0x20   : > { %4160 = vmatprep.mubr.msk.f32.mxu0 %vm225_vm1, %v4832_v5  ;;  %v4845_v8 = vld [vmem:[%s4826_s4 + $0x48] sm:$0xff]  ;;  %4005 = vmatmul.mubr.msk.f32.vlgmr.msra.gmra.mrb[0].mxu1 %vm225_vm1, %v4835_v6  ;;  %v4865_v12 = vld [vmem:[%s4826_s4 + $0x50] sm:$0xff]  ;;  %s5416_s6 = scalar_lea.hbm %s5480_s3, %s3771_s15 }
  0x21   : > { %v4848_v9 = vld [vmem:[%s4826_s4 + $0x88] sm:$0xff]  ;;  %4161 = vmatmul.mubr.msk.f32.vlgmr.msra.gmra.mrb[0].mxu0 %vm225_vm1, %v4842_v7  ;;  %4029 = vmatpush3.msk.msra.mxu1 %vm274_vm0, %v203_v2  ;;  %v4868_v13 = vld [vmem:[%s4826_s4 + $0x90] sm:$0xff] }
  0x22   : > { %4185 = vmatpush3.msk.msra.mxu0 %vm274_vm0, %v3573_v3  ;;  %4007 = vmatprep.mubr.msk.f32.mxu1 %vm225_vm1, %v4845_v8  ;;  %v4875_v14 = vld [vmem:[%s4826_s4 + $0xa8] sm:$0xff]  ;;  %v4889_v15 = vld [vmem:[%s4826_s4 + $0xb0] sm:$0xff] }
  0x23   : > { %4163 = vmatprep.mubr.msk.f32.mxu0 %vm225_vm1, %v4848_v9  ;;  %4210 = vmatprep.subr.msk.mxu0 %vm274_vm0, %v3607_v10  ;;  %v4892_v16 = vld [vmem:[%s4826_s4 + $0xc8] sm:$0xff]  ;;  %v4903_v17 = vld [vmem:[%s4826_s4 + $0xd0] sm:$0xff] }
  0x24   : > { %4054 = vmatprep.subr.msk.mxu1 %vm274_vm0, %v4860_v11  ;;  %4008 = vmatmul.mubr.msk.f32.gmra.mrb[2].mxu1 %vm225_vm1, %v4865_v12  ;;  %v3557_v18 = vld [vmem:[%s4826_s4 + $0x69] sm:$0xff]  ;;  %v3558_v19 = vld [vmem:[%s4826_s4 + $0x71] sm:$0xff] }
  0x25   : > { %4164 = vmatmul.mubr.msk.f32.gmra.mrb[2].mxu0 %vm225_vm1, %v4868_v13  ;;  %4010 = vmatprep.mubr.msk.f32.mxu1 %vm225_vm1, %v4832_v5  ;;  %v3559_v20 = vld [vmem:[%s4826_s4 + $0x89] sm:$0xff]  ;;  %v3560_v22 = vld [vmem:[%s4826_s4 + $0x91] sm:$0xff] }
  0x26   : > { %4166 = vmatprep.mubr.msk.f32.mxu0 %vm225_vm1, %v4875_v14  ;;  %v4929_v23 = vld [vmem:[%s4826_s4 + $0xe8] sm:$0xff]  ;;  %v4941_v25 = vld [vmem:[%s4826_s4 + $0xf0] sm:$0xff] }
  0x27   : > { %v3561_v24 = vld [vmem:[%s4826_s4 + $0xa9] sm:$0xff]  ;;  %v3562_v26 = vld [vmem:[%s4826_s4 + $0xb1] sm:$0xff] }
  0x28   : > { %4011 = vmatmul.mubr.msk.f32.gmra.mrb[4].mxu1 %vm225_vm1, %v4842_v7  ;;  %v4945_v27 = vld [vmem:[%s4826_s4 + $0x108] sm:$0xff]  ;;  %v4955_v29 = vld [vmem:[%s4826_s4 + $0x110] sm:$0xff] }
  0x29   : > { %4167 = vmatmul.mubr.msk.f32.gmra.mrb[4].mxu0 %vm225_vm1, %v4889_v15  ;;  %4013 = vmatprep.mubr.msk.f32.mxu1 %vm225_vm1, %v4848_v9  ;;  %v3563_v28 = vld [vmem:[%s4826_s4 + $0xc9] sm:$0xff]  ;;  %v3564_v30 = vld [vmem:[%s4826_s4 + $0xd1] sm:$0xff] }
  0x2a   : > { %4169 = vmatprep.mubr.msk.f32.mxu0 %vm225_vm1, %v4892_v16  ;;  %v187_v31 = vld [vmem:[%s4826_s4 + $0x8] sm:$0xff]  ;;  %v188_v33 = vld [vmem:[%s4826_s4 + $0x10] sm:$0xff] }
  0x2b   : > { %v3565_v32 = vld [vmem:[%s4826_s4 + $0xe9] sm:$0xff]  ;;  %v3566_v34 = vld [vmem:[%s4826_s4 + $0xf1] sm:$0xff] }
  0x2c   : > { %4014 = vmatmul.mubr.msk.f32.gmra.mrb[6].mxu1 %vm225_vm1, %v4868_v13  ;;  %v3567_v35 = vld [vmem:[%s4826_s4 + $0x109] sm:$0xff]  ;;  %v3568_v37 = vld [vmem:[%s4826_s4 + $0x111] sm:$0xff] }
  0x2d   : > { %4170 = vmatmul.mubr.msk.f32.gmra.mrb[6].mxu0 %vm225_vm1, %v4903_v17  ;;  %4016 = vmatprep.mubr.msk.f32.mxu1 %vm225_vm1, %v4875_v14  ;;  %v3569_v38 = vld [vmem:[%s4826_s4 + $0x129] sm:$0xff]  ;;  %v3570_v39 = vld [vmem:[%s4826_s4 + $0x131] sm:$0xff] }
  0x2e   : > { %4186 = vmatprep.mubr.msk.f32.mxu0 %vm225_vm1, %v3557_v18  ;;  %v3571_v40 = vld [vmem:[%s4826_s4 + $0x149] sm:$0xff]  ;;  %v3572_v41 = vld [vmem:[%s4826_s4 + $0x151] sm:$0xff] }
  0x2f   : > { %v3591_v42 = vld [vmem:[%s4826_s4 + $0x6a] sm:$0xff]  ;;  %v3592_v43 = vld [vmem:[%s4826_s4 + $0x72] sm:$0xff] }
  0x30   : > { %4017 = vmatmul.mubr.msk.f32.gmra.mrb[8].mxu1 %vm225_vm1, %v4889_v15  ;;  %v3593_v44 = vld [vmem:[%s4826_s4 + $0x8a] sm:$0xff]  ;;  %v3594_v46 = vld [vmem:[%s4826_s4 + $0x92] sm:$0xff] }
  0x31   : > { %4187 = vmatmul.mubr.msk.f32.vlgmr.msra.gmra.mrb[0].mxu0 %vm225_vm1, %v3558_v19  ;;  %4019 = vmatprep.mubr.msk.f32.mxu1 %vm225_vm1, %v4892_v16  ;;  %v3595_v47 = vld [vmem:[%s4826_s4 + $0xaa] sm:$0xff]  ;;  %v3596_v48 = vld [vmem:[%s4826_s4 + $0xb2] sm:$0xff] }
  0x32   : > { %4211 = vmatpush3.msk.msra.mxu0 %vm274_vm0, %v3607_v10  ;;  %4189 = vmatprep.mubr.msk.f32.mxu0 %vm225_vm1, %v3559_v20  ;;  %v3597_v49 = vld [vmem:[%s4826_s4 + $0xca] sm:$0xff]  ;;  %v3598_v50 = vld [vmem:[%s4826_s4 + $0xd2] sm:$0xff] }
  0x33   : > { %4236 = vmatprep.subr.msk.mxu0 %vm274_vm0, %v4918_v21  ;;  %v3599_v51 = vld [vmem:[%s4826_s4 + $0xea] sm:$0xff]  ;;  %v3600_v52 = vld [vmem:[%s4826_s4 + $0xf2] sm:$0xff] }
  0x34   : > { %4020 = vmatmul.mubr.msk.f32.gmra.mrb[10].mxu1 %vm225_vm1, %v4903_v17  ;;  %v3601_v53 = vld [vmem:[%s4826_s4 + $0x10a] sm:$0xff]  ;;  %v3602_v55 = vld [vmem:[%s4826_s4 + $0x112] sm:$0xff] }
  0x35   : > { %4190 = vmatmul.mubr.msk.f32.gmra.mrb[2].mxu0 %vm225_vm1, %v3560_v22  ;;  %4022 = vmatprep.mubr.msk.f32.mxu1 %vm225_vm1, %v4929_v23  ;;  %v3603_v56 = vld [vmem:[%s4826_s4 + $0x12a] sm:$0xff]  ;;  %v3604_v57 = vld [vmem:[%s4826_s4 + $0x132] sm:$0xff] }
  0x36   : > { %4192 = vmatprep.mubr.msk.f32.mxu0 %vm225_vm1, %v3561_v24  ;;  %v3605_v58 = vld [vmem:[%s4826_s4 + $0x14a] sm:$0xff]  ;;  %v3606_v59 = vld [vmem:[%s4826_s4 + $0x152] sm:$0xff] }
  0x37   : > { %v3625_v60 = vld [vmem:[%s4826_s4 + $0x6b] sm:$0xff]  ;;  %v3626_v61 = vld [vmem:[%s4826_s4 + $0x73] sm:$0xff] }
  0x38   : > { %4023 = vmatmul.mubr.msk.f32.gmra.mrb[12].mxu1 %vm225_vm1, %v4941_v25  ;;  %v3627_v62 = vld [vmem:[%s4826_s4 + $0x8b] sm:$0xff]  ;;  %v3628_v0 = vld [vmem:[%s4826_s4 + $0x93] sm:$0xff] }
  0x39   : > { %4193 = vmatmul.mubr.msk.f32.gmra.mrb[4].mxu0 %vm225_vm1, %v3562_v26  ;;  %4025 = vmatprep.mubr.msk.f32.mxu1 %vm225_vm1, %v4945_v27  ;;  %v3629_v2 = vld [vmem:[%s4826_s4 + $0xab] sm:$0xff]  ;;  %v3630_v3 = vld [vmem:[%s4826_s4 + $0xb3] sm:$0xff] }
  0x3a   : > { %4195 = vmatprep.mubr.msk.f32.mxu0 %vm225_vm1, %v3563_v28  ;;  %v3633_v10 = vld [vmem:[%s4826_s4 + $0xeb] sm:$0xff]  ;;  %v3505_v20 = vld [vmem:[%s5478_s1 + $0x14] sm:$0xf] }
  0x3b   : > { %v3423_v18 = vld [vmem:[%s4826_s4 + $0x85] sm:$0xff]  ;;  %v3636_v22 = vld [vmem:[%s4826_s4 + $0x113] sm:$0xff] }
  0x3c   : > { %4026 = vmatmul.mubr.msk.f32.gmra.mrb[14].mxu1 %vm225_vm1, %v4955_v29  ;;  %v3635_v19 = vld [vmem:[%s4826_s4 + $0x10b] sm:$0xff] }
  0x3d   : > { %4196 = vmatmul.mubr.msk.f32.gmra.mrb[6].mxu0 %vm225_vm1, %v3564_v30  ;;  %4030 = vmatprep.mubr.msk.f32.mxu1 %vm225_vm1, %v187_v31  ;;  %v3425_v24 = vld [vmem:[%s4826_s4 + $0xa5] sm:$0xff]  ;;  %v3426_v28 = vld [vmem:[%s4826_s4 + $0xad] sm:$0xff] }
  0x3e   : > { %4198 = vmatprep.mubr.msk.f32.mxu0 %vm225_vm1, %v3565_v32  ;;  %v3637_v26 = vld [vmem:[%s4826_s4 + $0x12b] sm:$0xff]  ;;  %v3638_v30 = vld [vmem:[%s4826_s4 + $0x133] sm:$0xff] }
  0x3f   : > { %v3427_v31 = vld [vmem:[%s4826_s4 + $0xc5] sm:$0xff] }
  0x40   : > { %4031 = vmatmul.mubr.msk.f32.vlgmr.msra.gmra.mrb[0].mxu1 %vm225_vm1, %v188_v33  ;;  %v3639_v32 = vld [vmem:[%s4826_s4 + $0x14b] sm:$0xff] }
  0x41   : > { %4199 = vmatmul.mubr.msk.f32.gmra.mrb[8].mxu0 %vm225_vm1, %v3566_v34  ;;  %4055 = vmatpush3.msk.msra.mxu1 %vm274_vm0, %v4860_v11  ;;  %v3422_v11 = vld [vmem:[%s4826_s4 + $0x6d] sm:$0xff] }
  0x42   : > { %4033 = vmatprep.mubr.msk.f32.mxu1 %vm225_vm1, %v4829_v4  ;;  %4201 = vmatprep.mubr.msk.f32.mxu0 %vm225_vm1, %v3567_v35  ;;  %v5104_v4 = vld [vmem:[%s4826_s4 + $0x128] sm:$0xff]  ;;  %v3640_v34 = vld [vmem:[%s4826_s4 + $0x153] sm:$0xff] }
  0x43   : > { %4080 = vmatprep.subr.msk.mxu1 %vm274_vm0, %v3437_v36  ;;  %v3428_v33 = vld [vmem:[%s4826_s4 + $0xcd] sm:$0xff]  ;;  %v3429_v35 = vld [vmem:[%s4826_s4 + $0xe5] sm:$0xff] }
  0x44   : > { %4034 = vmatmul.mubr.msk.f32.gmra.mrb[2].mxu1 %vm225_vm1, %v4835_v6  ;;  %v5114_v6 = vld [vmem:[%s4826_s4 + $0x130] sm:$0xff] }
  0x45   : > { %4202 = vmatmul.mubr.msk.f32.gmra.mrb[10].mxu0 %vm225_vm1, %v3568_v37  ;;  %4036 = vmatprep.mubr.msk.f32.mxu1 %vm225_vm1, %v4845_v8  ;;  %v3431_v37 = vld [vmem:[%s4826_s4 + $0x105] sm:$0xff] }
  0x46   : > { %4204 = vmatprep.mubr.msk.f32.mxu0 %vm225_vm1, %v3569_v38  ;;  %v3749_v38 = vld [vmem:[%s5478_s1 + $0x30] sm:$0xf] }
  0x48   : > { %4037 = vmatmul.mubr.msk.f32.gmra.mrb[4].mxu1 %vm225_vm1, %v4865_v12 }
  0x49   : > { %4205 = vmatmul.mubr.msk.f32.gmra.mrb[12].mxu0 %vm225_vm1, %v3570_v39  ;;  %4039 = vmatprep.mubr.msk.f32.mxu1 %vm225_vm1, %v4832_v5  ;;  %v3433_v39 = vld [vmem:[%s4826_s4 + $0x125] sm:$0xff] }
  0x4a   : > { %4207 = vmatprep.mubr.msk.f32.mxu0 %vm225_vm1, %v3571_v40  ;;  %v3435_v40 = vld [vmem:[%s4826_s4 + $0x145] sm:$0xff] }
  0x4c   : > { %4040 = vmatmul.mubr.msk.f32.gmra.mrb[6].mxu1 %vm225_vm1, %v4842_v7 }
  0x4d   : > { %4208 = vmatmul.mubr.msk.f32.gmra.mrb[14].mxu0 %vm225_vm1, %v3572_v41  ;;  %4042 = vmatprep.mubr.msk.f32.mxu1 %vm225_vm1, %v4848_v9  ;;  %v3436_v41 = vld [vmem:[%s4826_s4 + $0x14d] sm:$0xff] }
  0x4e   : > { %4212 = vmatprep.mubr.msk.f32.mxu0 %vm225_vm1, %v3591_v42  ;;  %v3455_v42 = vld [vmem:[%s4826_s4 + $0x66] sm:$0xff] }
  0x50   : > { %4043 = vmatmul.mubr.msk.f32.gmra.mrb[8].mxu1 %vm225_vm1, %v4868_v13 }
  0x51   : > { %4213 = vmatmul.mubr.msk.f32.vlgmr.msra.gmra.mrb[0].mxu0 %vm225_vm1, %v3592_v43  ;;  %4045 = vmatprep.mubr.msk.f32.mxu1 %vm225_vm1, %v4875_v14  ;;  %v3456_v43 = vld [vmem:[%s4826_s4 + $0x6e] sm:$0xff] }
  0x52   : > { %4237 = vmatpush3.msk.msra.mxu0 %vm274_vm0, %v4918_v21  ;;  %4215 = vmatprep.mubr.msk.f32.mxu0 %vm225_vm1, %v3593_v44  ;;  %v3424_v21 = vld [vmem:[%s4826_s4 + $0x8d] sm:$0xff] }
  0x53   : > { %4262 = vmatprep.subr.msk.mxu0 %vm274_vm0, %v3677_v45  ;;  %v3457_v44 = vld [vmem:[%s4826_s4 + $0x86] sm:$0xff] }
  0x54   : > { %4046 = vmatmul.mubr.msk.f32.gmra.mrb[10].mxu1 %vm225_vm1, %v4889_v15 }
  0x55   : > { %4216 = vmatmul.mubr.msk.f32.gmra.mrb[2].mxu0 %vm225_vm1, %v3594_v46  ;;  %4048 = vmatprep.mubr.msk.f32.mxu1 %vm225_vm1, %v4892_v16  ;;  %v3459_v46 = vld [vmem:[%s4826_s4 + $0xa6] sm:$0xff] }
  0x56   : > { %4218 = vmatprep.mubr.msk.f32.mxu0 %vm225_vm1, %v3595_v47  ;;  %v5211_v47 = vld [vmem:[%s4826_s4 + $0x148] sm:$0xff] }
  0x58   : > { %4049 = vmatmul.mubr.msk.f32.gmra.mrb[12].mxu1 %vm225_vm1, %v4903_v17 }
  0x59   : > { %4219 = vmatmul.mubr.msk.f32.gmra.mrb[4].mxu0 %vm225_vm1, %v3596_v48  ;;  %4051 = vmatprep.mubr.msk.f32.mxu1 %vm225_vm1, %v4929_v23  ;;  %v3460_v48 = vld [vmem:[%s4826_s4 + $0xae] sm:$0xff] }
  0x5a   : > { %4221 = vmatprep.mubr.msk.f32.mxu0 %vm225_vm1, %v3597_v49  ;;  %v5223_v49 = vld [vmem:[%s4826_s4 + $0x150] sm:$0xff] }
  0x5c   : > { %4052 = vmatmul.mubr.msk.f32.gmra.mrb[14].mxu1 %vm225_vm1, %v4941_v25 }
  0x5d   : > { %4222 = vmatmul.mubr.msk.f32.gmra.mrb[6].mxu0 %vm225_vm1, %v3598_v50  ;;  %4056 = vmatprep.mubr.msk.f32.mxu1 %vm225_vm1, %v4845_v8  ;;  %v3421_v8 = vld [vmem:[%s4826_s4 + $0x65] sm:$0xff] }
  0x5e   : > { %4224 = vmatprep.mubr.msk.f32.mxu0 %vm225_vm1, %v3599_v51  ;;  %v3461_v50 = vld [vmem:[%s4826_s4 + $0xc6] sm:$0xff] }
  0x5f   : > { %v5227_v51 = vld [vmem:[%s4826_s4 + $0x168] sm:$0xff] }
  0x60   : > { %4057 = vmatmul.mubr.msk.f32.vlgmr.msra.gmra.mrb[0].mxu1 %vm225_vm1, %v4865_v12  ;;  %v3634_v12 = vld [vmem:[%s4826_s4 + $0xf3] sm:$0xff] }
  0x61   : > { %4225 = vmatmul.mubr.msk.f32.gmra.mrb[8].mxu0 %vm225_vm1, %v3600_v52  ;;  %4081 = vmatpush3.msk.msra.mxu1 %vm274_vm0, %v3437_v36  ;;  %v3430_v36 = vld [vmem:[%s4826_s4 + $0xed] sm:$0xff] }
  0x62   : > { %4059 = vmatprep.mubr.msk.f32.mxu1 %vm225_vm1, %v4832_v5  ;;  %4227 = vmatprep.mubr.msk.f32.mxu0 %vm225_vm1, %v3601_v53  ;;  %v3631_v5 = vld [vmem:[%s4826_s4 + $0xcb] sm:$0xff] }
  0x63   : > { %4106 = vmatprep.subr.msk.mxu1 %vm274_vm0, %v3471_v54  ;;  %v3462_v52 = vld [vmem:[%s4826_s4 + $0xce] sm:$0xff] }
  0x64   : > { %4060 = vmatmul.mubr.msk.f32.gmra.mrb[2].mxu1 %vm225_vm1, %v4842_v7  ;;  %v3632_v7 = vld [vmem:[%s4826_s4 + $0xd3] sm:$0xff] }
  0x65   : > { %4228 = vmatmul.mubr.msk.f32.gmra.mrb[10].mxu0 %vm225_vm1, %v3602_v55  ;;  %4062 = vmatprep.mubr.msk.f32.mxu1 %vm225_vm1, %v4848_v9  ;;  %v5237_v53 = vld [vmem:[%s4826_s4 + $0x170] sm:$0xff] }
  0x66   : > { %4230 = vmatprep.mubr.msk.f32.mxu0 %vm225_vm1, %v3603_v56  ;;  %v3464_v55 = vld [vmem:[%s4826_s4 + $0xee] sm:$0xff]  ;;  %v3465_v56 = vld [vmem:[%s4826_s4 + $0x106] sm:$0xff] }
  0x68   : > { %4063 = vmatmul.mubr.msk.f32.gmra.mrb[4].mxu1 %vm225_vm1, %v4868_v13 }
  0x69   : > { %4231 = vmatmul.mubr.msk.f32.gmra.mrb[12].mxu0 %vm225_vm1, %v3604_v57  ;;  %4065 = vmatprep.mubr.msk.f32.mxu1 %vm225_vm1, %v4875_v14  ;;  %v3466_v57 = vld [vmem:[%s4826_s4 + $0x10e] sm:$0xff] }
  0x6a   : > { %4233 = vmatprep.mubr.msk.f32.mxu0 %vm225_vm1, %v3605_v58  ;;  %v3467_v58 = vld [vmem:[%s4826_s4 + $0x126] sm:$0xff] }
  0x6c   : > { %4066 = vmatmul.mubr.msk.f32.gmra.mrb[6].mxu1 %vm225_vm1, %v4889_v15 }
  0x6d   : > { %4234 = vmatmul.mubr.msk.f32.gmra.mrb[14].mxu0 %vm225_vm1, %v3606_v59  ;;  %4068 = vmatprep.mubr.msk.f32.mxu1 %vm225_vm1, %v4892_v16  ;;  %v3470_v59 = vld [vmem:[%s4826_s4 + $0x14e] sm:$0xff] }
  0x6e   : > { %4238 = vmatprep.mubr.msk.f32.mxu0 %vm225_vm1, %v3625_v60  ;;  %v3489_v60 = vld [vmem:[%s4826_s4 + $0x67] sm:$0xff] }
  0x70   : > { %4069 = vmatmul.mubr.msk.f32.gmra.mrb[8].mxu1 %vm225_vm1, %v4903_v17 }
  0x71   : > { %4239 = vmatmul.mubr.msk.f32.vlgmr.msra.gmra.mrb[0].mxu0 %vm225_vm1, %v3626_v61  ;;  %4071 = vmatprep.mubr.msk.f32.mxu1 %vm225_vm1, %v4929_v23  ;;  %v3490_v61 = vld [vmem:[%s4826_s4 + $0x6f] sm:$0xff] }
  0x72   : > { %4263 = vmatpush3.msk.msra.mxu0 %vm274_vm0, %v3677_v45  ;;  %4241 = vmatprep.mubr.msk.f32.mxu0 %vm225_vm1, %v3627_v62  ;;  %v3458_v45 = vld [vmem:[%s4826_s4 + $0x8e] sm:$0xff] }
  0x73   : > { %4288 = vmatprep.subr.msk.mxu0 %vm274_vm0, %v5083_v63  ;;  %v3491_v62 = vld [vmem:[%s4826_s4 + $0x87] sm:$0xff] }
  0x74   : > { %4072 = vmatmul.mubr.msk.f32.gmra.mrb[10].mxu1 %vm225_vm1, %v4941_v25 }
  0x75   : > { %4242 = vmatmul.mubr.msk.f32.gmra.mrb[2].mxu0 %vm225_vm1, %v3628_v0  ;;  %4074 = vmatprep.mubr.msk.f32.mxu1 %vm225_vm1, %v4945_v27  ;;  %v3493_v0 = vld [vmem:[%s4826_s4 + $0xa7] sm:$0xff] }
  0x76   : > { %4244 = vmatprep.mubr.msk.f32.mxu0 %vm225_vm1, %v3629_v2  ;;  %v3495_v2 = vld [vmem:[%s4826_s4 + $0xc7] sm:$0xff] }
  0x78   : > { %4075 = vmatmul.mubr.msk.f32.gmra.mrb[12].mxu1 %vm225_vm1, %v4955_v29 }
  0x79   : > { %4245 = vmatmul.mubr.msk.f32.gmra.mrb[4].mxu0 %vm225_vm1, %v3630_v3  ;;  %4077 = vmatprep.mubr.msk.f32.mxu1 %vm225_vm1, %v5104_v4  ;;  %v3711_v3 = vld [vmem:[%s4826_s4 + $0x188] sm:$0xff] }
  0x7a   : > { %4247 = vmatprep.mubr.msk.f32.mxu0 %vm225_vm1, %v3631_v5  ;;  %v3496_v5 = vld [vmem:[%s4826_s4 + $0xcf] sm:$0xff] }
  0x7c   : > { %4078 = vmatmul.mubr.msk.f32.gmra.mrb[14].mxu1 %vm225_vm1, %v5114_v6 }
  0x7d   : > { %4248 = vmatmul.mubr.msk.f32.gmra.mrb[6].mxu0 %vm225_vm1, %v3632_v7  ;;  %4082 = vmatprep.mubr.msk.f32.mxu1 %vm225_vm1, %v3421_v8  ;;  %v3712_v7 = vld [vmem:[%s4826_s4 + $0x190] sm:$0xff]  ;;  %v3497_v8 = vld [vmem:[%s4826_s4 + $0xe7] sm:$0xff] }
  0x7e   : > { %4250 = vmatprep.mubr.msk.f32.mxu0 %vm225_vm1, %v3633_v10  ;;  %v3498_v10 = vld [vmem:[%s4826_s4 + $0xef] sm:$0xff] }
  0x80   : > { %4083 = vmatmul.mubr.msk.f32.vlgmr.msra.gmra.mrb[0].mxu1 %vm225_vm1, %v3422_v11  ;;  %v3499_v11 = vld [vmem:[%s4826_s4 + $0x107] sm:$0xff] }
  0x81   : > { %4251 = vmatmul.mubr.msk.f32.gmra.mrb[8].mxu0 %vm225_vm1, %v3634_v12  ;;  %4107 = vmatpush3.msk.msra.mxu1 %vm274_vm0, %v3471_v54  ;;  %v3463_v54 = vld [vmem:[%s4826_s4 + $0xe6] sm:$0xff]  ;;  %v3500_v12 = vld [vmem:[%s4826_s4 + $0x10f] sm:$0xff] }
  0x82   : > { %4085 = vmatprep.mubr.msk.f32.mxu1 %vm225_vm1, %v3423_v18  ;;  %4253 = vmatprep.mubr.msk.f32.mxu0 %vm225_vm1, %v3635_v19  ;;  %v3501_v18 = vld [vmem:[%s4826_s4 + $0x127] sm:$0xff] }
  0x83   : > { %4132 = vmatprep.subr.msk.mxu1 %vm274_vm0, %v3505_v20  ;;  %v3503_v19 = vld [vmem:[%s4826_s4 + $0x147] sm:$0xff] }
  0x84   : > { %4086 = vmatmul.mubr.msk.f32.gmra.mrb[2].mxu1 %vm225_vm1, %v3424_v21 }
  0x85   : > { %4254 = vmatmul.mubr.msk.f32.gmra.mrb[10].mxu0 %vm225_vm1, %v3636_v22  ;;  %4088 = vmatprep.mubr.msk.f32.mxu1 %vm225_vm1, %v3425_v24 }
  0x86   : > { %4256 = vmatprep.mubr.msk.f32.mxu0 %vm225_vm1, %v3637_v26 }
  0x88   : > { %4089 = vmatmul.mubr.msk.f32.gmra.mrb[4].mxu1 %vm225_vm1, %v3426_v28  ;;  %v5377_v28 = vld [vmem:[%s5479_s2] ss:$0 sm:$0xff] }
  0x89   : > { %4257 = vmatmul.mubr.msk.f32.gmra.mrb[12].mxu0 %vm225_vm1, %v3638_v30  ;;  %4091 = vmatprep.mubr.msk.f32.mxu1 %vm225_vm1, %v3427_v31 }
  0x8a   : > { %4259 = vmatprep.mubr.msk.f32.mxu0 %vm225_vm1, %v3639_v32 }
  0x8c   : > { %4092 = vmatmul.mubr.msk.f32.gmra.mrb[6].mxu1 %vm225_vm1, %v3428_v33 }
  0x8d   : > { %4260 = vmatmul.mubr.msk.f32.gmra.mrb[14].mxu0 %vm225_vm1, %v3640_v34  ;;  %4094 = vmatprep.mubr.msk.f32.mxu1 %vm225_vm1, %v3429_v35 }
  0x8e   : > { %4264 = vmatprep.mubr.msk.f32.mxu0 %vm225_vm1, %v4848_v9  ;;  %v3432_v9 = vld [vmem:[%s4826_s4 + $0x10d] sm:$0xff] }
  0x90   : > { %4095 = vmatmul.mubr.msk.f32.gmra.mrb[8].mxu1 %vm225_vm1, %v3430_v36 }
  0x91   : > { %4265 = vmatmul.mubr.msk.f32.vlgmr.msra.gmra.mrb[0].mxu0 %vm225_vm1, %v4868_v13  ;;  %4097 = vmatprep.mubr.msk.f32.mxu1 %vm225_vm1, %v3431_v37  ;;  %v3434_v13 = vld [vmem:[%s4826_s4 + $0x12d] sm:$0xff] }
  0x92   : > { %4289 = vmatpush3.msk.msra.mxu0 %vm274_vm0, %v5083_v63  ;;  %4267 = vmatprep.mubr.msk.f32.mxu0 %vm225_vm1, %v4875_v14  ;;  %v3492_v63 = vld [vmem:[%s4826_s4 + $0x8f] sm:$0xff] }
  0x93   : > { %4314 = vmatprep.subr.msk.mxu0 %vm274_vm0, %v3749_v38 }
  0x94   : > { %4098 = vmatmul.mubr.msk.f32.gmra.mrb[10].mxu1 %vm225_vm1, %v3432_v9 }
  0x95   : > { %4268 = vmatmul.mubr.msk.f32.gmra.mrb[2].mxu0 %vm225_vm1, %v4889_v15  ;;  %4100 = vmatprep.mubr.msk.f32.mxu1 %vm225_vm1, %v3433_v39 }
  0x96   : > { %4270 = vmatprep.mubr.msk.f32.mxu0 %vm225_vm1, %v4892_v16 }
  0x98   : > { %4101 = vmatmul.mubr.msk.f32.gmra.mrb[12].mxu1 %vm225_vm1, %v3434_v13 }
  0x99   : > { %4271 = vmatmul.mubr.msk.f32.gmra.mrb[4].mxu0 %vm225_vm1, %v4903_v17  ;;  %4103 = vmatprep.mubr.msk.f32.mxu1 %vm225_vm1, %v3435_v40 }
  0x9a   : > { %4273 = vmatprep.mubr.msk.f32.mxu0 %vm225_vm1, %v4929_v23 }
  0x9c   : > { %4104 = vmatmul.mubr.msk.f32.gmra.mrb[14].mxu1 %vm225_vm1, %v3436_v41 }
  0x9d   : > { %4274 = vmatmul.mubr.msk.f32.gmra.mrb[6].mxu0 %vm225_vm1, %v4941_v25  ;;  %4108 = vmatprep.mubr.msk.f32.mxu1 %vm225_vm1, %v3455_v42 }
  0x9e   : > { %4276 = vmatprep.mubr.msk.f32.mxu0 %vm225_vm1, %v4945_v27 }
  0xa0   : > { %4109 = vmatmul.mubr.msk.f32.vlgmr.msra.gmra.mrb[0].mxu1 %vm225_vm1, %v3456_v43 }
  0xa1   : > { %4277 = vmatmul.mubr.msk.f32.gmra.mrb[8].mxu0 %vm225_vm1, %v4955_v29  ;;  %4133 = vmatpush3.msk.msra.mxu1 %vm274_vm0, %v3505_v20 }
  0xa2   : > { %4111 = vmatprep.mubr.msk.f32.mxu1 %vm225_vm1, %v3457_v44  ;;  %4279 = vmatprep.mubr.msk.f32.mxu0 %vm225_vm1, %v5104_v4 }
  0xa3   : > { %4340 = vmatprep.subr.msk.mxu1 %vm274_vm0, %v4804_v1 }
  0xa4   : > { %4112 = vmatmul.mubr.msk.f32.gmra.mrb[2].mxu1 %vm225_vm1, %v3458_v45 }
  0xa5   : > { %4280 = vmatmul.mubr.msk.f32.gmra.mrb[10].mxu0 %vm225_vm1, %v5114_v6  ;;  %4114 = vmatprep.mubr.msk.f32.mxu1 %vm225_vm1, %v3459_v46 }
  0xa6   : > { %4282 = vmatprep.mubr.msk.f32.mxu0 %vm225_vm1, %v5211_v47 }
  0xa8   : > { %4115 = vmatmul.mubr.msk.f32.gmra.mrb[4].mxu1 %vm225_vm1, %v3460_v48 }
  0xa9   : > { %4283 = vmatmul.mubr.msk.f32.gmra.mrb[12].mxu0 %vm225_vm1, %v5223_v49  ;;  %4117 = vmatprep.mubr.msk.f32.mxu1 %vm225_vm1, %v3461_v50 }
  0xaa   : > { %4285 = vmatprep.mubr.msk.f32.mxu0 %vm225_vm1, %v5227_v51 }
  0xac   : > { %4118 = vmatmul.mubr.msk.f32.gmra.mrb[6].mxu1 %vm225_vm1, %v3462_v52 }
  0xad   : > { %4286 = vmatmul.mubr.msk.f32.gmra.mrb[14].mxu0 %vm225_vm1, %v5237_v53  ;;  %4120 = vmatprep.mubr.msk.f32.mxu1 %vm225_vm1, %v3463_v54 }
  0xae   : > { %4290 = vmatprep.mubr.msk.f32.mxu0 %vm225_vm1, %v4875_v14  ;;  %v3468_v14 = vld [vmem:[%s4826_s4 + $0x12e] sm:$0xff] }
  0xb0   : > { %4121 = vmatmul.mubr.msk.f32.gmra.mrb[8].mxu1 %vm225_vm1, %v3464_v55 }
  0xb1   : > { %4291 = vmatmul.mubr.msk.f32.vlgmr.msra.gmra.mrb[0].mxu0 %vm225_vm1, %v4889_v15  ;;  %4123 = vmatprep.mubr.msk.f32.mxu1 %vm225_vm1, %v3465_v56  ;;  %v3469_v15 = vld [vmem:[%s4826_s4 + $0x146] sm:$0xff] }
  0xb2   : > { %4315 = vmatpush3.msk.msra.mxu0 %vm274_vm0, %v3749_v38  ;;  %4293 = vmatprep.mubr.msk.f32.mxu0 %vm225_vm1, %v4892_v16 }
  0xb4   : > { %4124 = vmatmul.mubr.msk.f32.gmra.mrb[10].mxu1 %vm225_vm1, %v3466_v57 }
  0xb5   : > { %4294 = vmatmul.mubr.msk.f32.gmra.mrb[2].mxu0 %vm225_vm1, %v4903_v17  ;;  %4126 = vmatprep.mubr.msk.f32.mxu1 %vm225_vm1, %v3467_v58 }
  0xb6   : > { %4296 = vmatprep.mubr.msk.f32.mxu0 %vm225_vm1, %v4929_v23 }
  0xb8   : > { %4127 = vmatmul.mubr.msk.f32.gmra.mrb[12].mxu1 %vm225_vm1, %v3468_v14 }
  0xb9   : > { %4297 = vmatmul.mubr.msk.f32.gmra.mrb[4].mxu0 %vm225_vm1, %v4941_v25  ;;  %4129 = vmatprep.mubr.msk.f32.mxu1 %vm225_vm1, %v3469_v15 }
  0xba   : > { %4299 = vmatprep.mubr.msk.f32.mxu0 %vm225_vm1, %v4945_v27 }
  0xbc   : > { %4130 = vmatmul.mubr.msk.f32.gmra.mrb[14].mxu1 %vm225_vm1, %v3470_v59 }
  0xbd   : > { %4300 = vmatmul.mubr.msk.f32.gmra.mrb[6].mxu0 %vm225_vm1, %v4955_v29  ;;  %4134 = vmatprep.mubr.msk.f32.mxu1 %vm225_vm1, %v3489_v60 }
  0xbe   : > { %4302 = vmatprep.mubr.msk.f32.mxu0 %vm225_vm1, %v5104_v4 }
  0xc0   : > { %4135 = vmatmul.mubr.msk.f32.vlgmr.msra.gmra.mrb[0].mxu1 %vm225_vm1, %v3490_v61 }
  0xc1   : > { %4303 = vmatmul.mubr.msk.f32.gmra.mrb[8].mxu0 %vm225_vm1, %v5114_v6  ;;  %4341 = vmatpush3.msk.msra.mxu1 %vm274_vm0, %v4804_v1  ;;  %v3494_v1 = vld [vmem:[%s4826_s4 + $0xaf] sm:$0xff] }
  0xc2   : > { %4137 = vmatprep.mubr.msk.f32.mxu1 %vm225_vm1, %v3491_v62  ;;  %4305 = vmatprep.mubr.msk.f32.mxu0 %vm225_vm1, %v5211_v47 }
  0xc4   : > { %4138 = vmatmul.mubr.msk.f32.gmra.mrb[2].mxu1 %vm225_vm1, %v3492_v63 }
  0xc5   : > { %4306 = vmatmul.mubr.msk.f32.gmra.mrb[10].mxu0 %vm225_vm1, %v5223_v49  ;;  %4140 = vmatprep.mubr.msk.f32.mxu1 %vm225_vm1, %v3493_v0 }
  0xc6   : > { %4308 = vmatprep.mubr.msk.f32.mxu0 %vm225_vm1, %v5227_v51 }
  0xc8   : > { %4141 = vmatmul.mubr.msk.f32.gmra.mrb[4].mxu1 %vm225_vm1, %v3494_v1 }
  0xc9   : > { %4309 = vmatmul.mubr.msk.f32.gmra.mrb[12].mxu0 %vm225_vm1, %v5237_v53  ;;  %4143 = vmatprep.mubr.msk.f32.mxu1 %vm225_vm1, %v3495_v2 }
  0xca   : > { %4311 = vmatprep.mubr.msk.f32.mxu0 %vm225_vm1, %v3711_v3 }
  0xcc   : > { %4144 = vmatmul.mubr.msk.f32.gmra.mrb[6].mxu1 %vm225_vm1, %v3496_v5 }
  0xcd   : > { %4312 = vmatmul.mubr.msk.f32.gmra.mrb[14].mxu0 %vm225_vm1, %v3712_v7  ;;  %4146 = vmatprep.mubr.msk.f32.mxu1 %vm225_vm1, %v3497_v8 }
  0xce   : > { %4316 = vmatprep.mubr.msk.f32.mxu0 %vm225_vm1, %v4892_v16  ;;  %v3502_v16 = vld [vmem:[%s4826_s4 + $0x12f] sm:$0xff] }
  0xd0   : > { %4147 = vmatmul.mubr.msk.f32.gmra.mrb[8].mxu1 %vm225_vm1, %v3498_v10 }
  0xd1   : > { %4317 = vmatmul.mubr.msk.f32.vlgmr.msra.gmra.mrb[0].mxu0 %vm225_vm1, %v4903_v17  ;;  %4149 = vmatprep.mubr.msk.f32.mxu1 %vm225_vm1, %v3499_v11  ;;  %v3504_v17 = vld [vmem:[%s4826_s4 + $0x14f] sm:$0xff] }
  0xd2   : > { %4319 = vmatprep.mubr.msk.f32.mxu0 %vm225_vm1, %v4929_v23 }
  0xd4   : > { %4150 = vmatmul.mubr.msk.f32.gmra.mrb[10].mxu1 %vm225_vm1, %v3500_v12 }
  0xd5   : > { %4320 = vmatmul.mubr.msk.f32.gmra.mrb[2].mxu0 %vm225_vm1, %v4941_v25  ;;  %4152 = vmatprep.mubr.msk.f32.mxu1 %vm225_vm1, %v3501_v18 }
  0xd6   : > { %4322 = vmatprep.mubr.msk.f32.mxu0 %vm225_vm1, %v4945_v27 }
  0xd8   : > { %4153 = vmatmul.mubr.msk.f32.gmra.mrb[12].mxu1 %vm225_vm1, %v3502_v16 }
  0xd9   : > { %4323 = vmatmul.mubr.msk.f32.gmra.mrb[4].mxu0 %vm225_vm1, %v4955_v29  ;;  %4155 = vmatprep.mubr.msk.f32.mxu1 %vm225_vm1, %v3503_v19 }
  0xda   : > { %4325 = vmatprep.mubr.msk.f32.mxu0 %vm225_vm1, %v5104_v4 }
  0xdc   : > { %4156 = vmatmul.mubr.msk.f32.gmra.mrb[14].mxu1 %vm225_vm1, %v3504_v17 }
  0xdd   : > { %4326 = vmatmul.mubr.msk.f32.gmra.mrb[6].mxu0 %vm225_vm1, %v5114_v6  ;;  %4172 = vmatprep.mubr.msk.f32.mxu1 %vm225_vm1, %v4929_v23  ;;  %v3747_v23 = vld [vmem:[%s4826_s4 + $0x1a8] sm:$0xff] }
  0xde   : > { %4328 = vmatprep.mubr.msk.f32.mxu0 %vm225_vm1, %v5211_v47 }
  0xe0   : > { %4173 = vmatmul.mubr.msk.f32.vlgmr.msra.gmra.mrb[8].mxu1 %vm225_vm1, %v4941_v25  ;;  %v3748_v25 = vld [vmem:[%s4826_s4 + $0x1b0] sm:$0xff]  ;;  %s5381_s4 = scalar_lea.vmem [#allocation2], %s3326_s11  ;;  %s4612_s11 = sshll.u32 %s4704_s9, 4  ;;  %s4613_s11 = int_to_ptr.vmem [resolvable:$false] %s4612_s11 }
  0xe1   : > { %4329 = vmatmul.mubr.msk.f32.gmra.mrb[8].mxu0 %vm225_vm1, %v5223_v49  ;;  %4175 = vmatprep.mubr.msk.f32.mxu1 %vm225_vm1, %v4945_v27  ;;  %s3219_s16 = sshll.u32 %s5381_s4, 4  ;;  %s4614_s20 = scalar_lea.vmem %s4613_s11, 4096  ;;  %s5418_s16 = int_to_ptr.vmem [resolvable:$true] %s3219_s16 }
  0xe2   : > { %4331 = vmatprep.mubr.msk.f32.mxu0 %vm225_vm1, %v5227_v51  ;;  %s4608_s8 = scalar_lea.vmem %s5418_s16, 2048  ;;  %p4615_p2 = scmp.lt.s32.totalorder %s5418_s16, %s4613_s11 }
  0xe3   : > { %p4609_p13 = scmp.ne.s32.totalorder %s5418_s16, %s4608_s8  ;;  %p4616_p4 = scmp.lt.s32.totalorder %s4614_s20, %s4608_s8 }
  0xe4   : > { %4176 = vmatmul.mubr.msk.f32.gmra.mrb[10].mxu1 %vm225_vm1, %v4955_v29 }
  0xe5   : > { %4332 = vmatmul.mubr.msk.f32.gmra.mrb[10].mxu0 %vm225_vm1, %v5237_v53  ;;  %4178 = vmatprep.mubr.msk.f32.mxu1 %vm225_vm1, %v5104_v4  ;;  %p4610_p0 = pnand %p4609_p13, %p4778_p3  ;;  %p4617_p5 = por %p4616_p4, %p4615_p2 }
  0xe6   : > { %4334 = vmatprep.mubr.msk.f32.mxu0 %vm225_vm1, %v3711_v3 }
  0xe7   : > { %p4611_p1 = pneg %p4610_p0 }
  0xe8   : > { %4179 = vmatmul.mubr.msk.f32.gmra.mrb[12].mxu1 %vm225_vm1, %v5114_v6 }
  0xe9   : > { %4335 = vmatmul.mubr.msk.f32.gmra.mrb[12].mxu0 %vm225_vm1, %v3712_v7  ;;  %4181 = vmatprep.mubr.msk.f32.mxu1 %vm225_vm1, %v5211_v47  ;;  %p4618_p6 = pnand %p4617_p5, %p4611_p1 }
  0xea   : > { %4337 = vmatprep.mubr.msk.f32.mxu0 %vm225_vm1, %v3747_v23 }
  0xec   : > { %4182 = vmatmul.mubr.msk.f32.gmra.mrb[14].mxu1 %vm225_vm1, %v5223_v49 }
  0xed   : > { %4338 = vmatmul.mubr.msk.f32.gmra.mrb[14].mxu0 %vm225_vm1, %v3748_v25 }
 0x193   : > { %v4136_v27 = vpop.f32.mrb[0].mxu1 }
 0x194   : > { %v1450_v29 = vpop.f32.mrb[1].mxu1 }
 0x197   : > { %v4139_v4 = vpop.f32.mrb[2].mxu1 }
 0x198   : > { %v1460_v20 = vpop.f32.mrb[3].mxu1 }
 0x19b   : > { %v4142_v21 = vpop.f32.mrb[4].mxu1 }
 0x19c   : > { %v1470_v6 = vpop.f32.mrb[5].mxu1 }
 0x19f   : > { %v4145_v22 = vpop.f32.mrb[6].mxu1 }
 0x1a0   : > { %v1480_v24 = vpop.f32.mrb[7].mxu1 }
 0x1a4   : > { %v4318_v26 = vpop.f32.mrb[0].mxu0 }
 0x1a5   : > { %v4342_v30 = vadd.f32 %v4318_v26, %v4136_v27  ;;  %v3069_v31 = vpop.f32.mrb[1].mxu0 }
 0x1a6   : > { %v4343_v32 = vadd.f32 %v3069_v31, %v1450_v29 }
 0x1a7   : > { %v3172_v33 = vadd.f32 %v4342_v30, %v5377_v28 }
 0x1a8   : > { %v3171_v34 = vadd.f32 %v4343_v32, %v5377_v28  ;;  %v4321_v35 = vpop.f32.mrb[2].mxu0 }
 0x1a9   : > { %3188 = vst [vmem:[%s5381_s4 + $0x8] sm:$0xff] %v3172_v33  ;;  %v4344_v36 = vadd.f32 %v4321_v35, %v4139_v4  ;;  %v3079_v37 = vpop.f32.mrb[3].mxu0 }
 0x1aa   : > { %3187 = vst [vmem:[%s5381_s4] sm:$0xff] %v3171_v34  ;;  %v4345_v38 = vadd.f32 %v3079_v37, %v1460_v20 }
 0x1ab   : > { %v3174_v9 = vadd.f32 %v4344_v36, %v5377_v28 }
 0x1ac   : > { %v3173_v39 = vadd.f32 %v4345_v38, %v5377_v28  ;;  %v4324_v13 = vpop.f32.mrb[4].mxu0 }
 0x1ad   : > { %3190 = vst [vmem:[%s5381_s4 + $0x18] sm:$0xff] %v3174_v9  ;;  %v4346_v40 = vadd.f32 %v4324_v13, %v4142_v21  ;;  %v3089_v41 = vpop.f32.mrb[5].mxu0 }
 0x1ae   : > { %3189 = vst [vmem:[%s5381_s4 + $0x10] sm:$0xff] %v3173_v39  ;;  %v4347_v42 = vadd.f32 %v3089_v41, %v1470_v6 }
 0x1af   : > { %v3176_v43 = vadd.f32 %v4346_v40, %v5377_v28 }
 0x1b0   : > { %v3175_v44 = vadd.f32 %v4347_v42, %v5377_v28  ;;  %v4327_v45 = vpop.f32.mrb[6].mxu0 }
 0x1b1   : > { %3192 = vst [vmem:[%s5381_s4 + $0x28] sm:$0xff] %v3176_v43  ;;  %v4348_v46 = vadd.f32 %v4327_v45, %v4145_v22  ;;  %v3099_v47 = vpop.f32.mrb[7].mxu0 }
 0x1b2   : > { %3191 = vst [vmem:[%s5381_s4 + $0x20] sm:$0xff] %v3175_v44  ;;  %v4349_v48 = vadd.f32 %v3099_v47, %v1480_v24 }
 0x1b3   : > { %v3178_v49 = vadd.f32 %v4348_v46, %v5377_v28  ;;  %v4174_v51 = vpop.f32.mrb[8].mxu1 }
 0x1b4   : > { %v3177_v50 = vadd.f32 %v4349_v48, %v5377_v28  ;;  %v4330_v52 = vpop.f32.mrb[8].mxu0  ;;  %v1720_v54 = vpop.f32.mrb[9].mxu1 }
 0x1b5   : > { %3194 = vst [vmem:[%s5381_s4 + $0x38] sm:$0xff] %v3178_v49  ;;  %v4350_v53 = vadd.f32 %v4330_v52, %v4174_v51  ;;  %v3109_v55 = vpop.f32.mrb[9].mxu0 }
 0x1b6   : > { %3193 = vst [vmem:[%s5381_s4 + $0x30] sm:$0xff] %v3177_v50  ;;  %v4351_v56 = vadd.f32 %v3109_v55, %v1720_v54 }
 0x1b7   : > { %v3180_v57 = vadd.f32 %v4350_v53, %v5377_v28  ;;  %v4177_v14 = vpop.f32.mrb[10].mxu1 }
 0x1b8   : > { %v3179_v58 = vadd.f32 %v4351_v56, %v5377_v28  ;;  %v4333_v15 = vpop.f32.mrb[10].mxu0  ;;  %v1730_v60 = vpop.f32.mrb[11].mxu1 }
 0x1b9   : > { %3196 = vst [vmem:[%s5381_s4 + $0x48] sm:$0xff] %v3180_v57  ;;  %v4352_v59 = vadd.f32 %v4333_v15, %v4177_v14  ;;  %v3119_v61 = vpop.f32.mrb[11].mxu0 }
 0x1ba   : > { %3195 = vst [vmem:[%s5381_s4 + $0x40] sm:$0xff] %v3179_v58  ;;  %v4353_v62 = vadd.f32 %v3119_v61, %v1730_v60 }
 0x1bb   : > { %v3182_v63 = vadd.f32 %v4352_v59, %v5377_v28  ;;  %v4180_v1 = vpop.f32.mrb[12].mxu1 }
 0x1bc   : > { %v3181_v0 = vadd.f32 %v4353_v62, %v5377_v28  ;;  %v4336_v2 = vpop.f32.mrb[12].mxu0  ;;  %v1740_v5 = vpop.f32.mrb[13].mxu1 }
 0x1bd   : > { %3198 = vst [vmem:[%s5381_s4 + $0x58] sm:$0xff] %v3182_v63  ;;  %v4354_v3 = vadd.f32 %v4336_v2, %v4180_v1  ;;  %v3129_v7 = vpop.f32.mrb[13].mxu0 }
 0x1be   : > { %3197 = vst [vmem:[%s5381_s4 + $0x50] sm:$0xff] %v3181_v0  ;;  %v4355_v8 = vadd.f32 %v3129_v7, %v1740_v5 }
 0x1bf   : > { %v3184_v10 = vadd.f32 %v4354_v3, %v5377_v28  ;;  %v4183_v12 = vpop.f32.mrb[14].mxu1 }
 0x1c0   : > { %v3183_v11 = vadd.f32 %v4355_v8, %v5377_v28  ;;  %v4339_v18 = vpop.f32.mrb[14].mxu0  ;;  %v1750_v19 = vpop.f32.mrb[15].mxu1 }
 0x1c1   : > { %3200 = vst [vmem:[%s5381_s4 + $0x68] sm:$0xff] %v3184_v10  ;;  %v4356_v16 = vadd.f32 %v4339_v18, %v4183_v12  ;;  %v3139_v17 = vpop.f32.mrb[15].mxu0 }
 0x1c2   : > { %3199 = vst [vmem:[%s5381_s4 + $0x60] sm:$0xff] %v3183_v11  ;;  %v4357_v23 = vadd.f32 %v3139_v17, %v1750_v19 }
 0x1c3   : > { %v3186_v25 = vadd.f32 %v4356_v16, %v5377_v28 }
 0x1c4   : > { %v3185_v27 = vadd.f32 %v4357_v23, %v5377_v28 }
 0x1c5   : > { %3202 = vst [vmem:[%s5381_s4 + $0x78] sm:$0xff] %v3186_v25 }
 0x1c6   : > { %3201 = vst [vmem:[%s5381_s4 + $0x70] sm:$0xff] %v3185_v27 }
 0x1c7   : > { %4621 = shalt.err (!%p4618_p6)
}
 0x1c8   : > { %s4622_s10 = scalar_lea.hbm %s5416_s6, 2048  ;;  %s4626_s24 = scalar_lea.hbm %s5480_s3, 8192 }
 0x1c9   : > { %p4623_p7 = scmp.ne.s32.totalorder %s5416_s6, %s4622_s10  ;;  %p4627_p11 = scmp.lt.u32.totalorder %s5416_s6, %s5480_s3 }
 0x1ca   : > { %p4628_p12 = scmp.lt.u32.totalorder %s4626_s24, %s4622_s10  ;;  %p4630_p0 = scmp.lt.u32.totalorder %s4622_s10, %s5416_s6 }
 0x1cb   : > { %p4624_p9 = pnand %p4623_p7, %p4778_p3 }
 0x1cc   : > { %p4629_p13 = por %p4628_p12, %p4627_p11 }
 0x1cd   : > { %p4625_p10 = pneg %p4624_p9 }
 0x1ce   : > { %p4631_p1 = por %p4630_p0, %p4629_p13 }
 0x1d0   : > { %p4632_p2 = pnand %p4631_p1, %p4625_p10 }
 0x1d2   : > { %4635 = shalt.err (!%p4632_p2)
}
 0x1d3   : > { %s4705_s15 = smov 128   ;;  %s4706_s29 = smov 8  }
 0x1d4   : > { %4535 = dma.vmem_to_hbm [thread:$0]  (%p4778_p3), %s5418_s16, 2048, %s5416_s6, %s5425_s7, %s4705_s15, %s4705_s15, %s4706_s29  }
 0x1d5 PF: > { %p4541_p4 = scmp.ge.s32.totalorder %s4702_s19, 2  ;;  %s3234_s5 = sand.u32 1, %s4674_s12  }
 0x1d6   : > { %s3235_s8 = scalar_lea.sflag [#allocation3], %s3234_s5 }
 0x1d7   : > { %p4538_p5 = pnand %p4541_p4, %p4787_p8 }
 0x1d9   : > { %4669 = dma.done.wait (!%p4538_p5), %s3235_s8, 2048  }
 0x1da   : > { %4671 = vsyncadd (!%p4538_p5), %s3235_s8, 4294965248  ;;  %s16_s19 = sadd.s32 1, %s4702_s19   ;;  %s5483_s12 = smov %s4678_s13 }
 0x1db   : > { %p13_p6 = scmp.ge.s32.totalorder %s16_s19, 6   ;;  %s5484_s13 = smov %s4682_s14 }
 0x1dc   : > { %s5485_s14 = smov %s4796_s30  ;;  %s5486_s15 = smov %s4694_s17 }
 0x1dd   : > { %s5487_s16 = smov %s4698_s18  ;;  %s5488_s17 = smov %s5491_s22 }
 0x1de   : > { %s5489_s18 = smov %s5495_s23  ;;  %15 = sbr.rel (!%p13_p6) target bundleno = 5 (0x5), region = 86 }
 0x1e5   :  { %3240 = vsyncpa [#allocation3], 1 }
 0x1e6   :  { %3242 = vsyncpa [#allocation3 + $0x1], 1 }

</bundles_post_ra>
